<compile_context>
chip_gen: v7x
topology: tpu7x:2x2x1
jax: 0.10.0
libtpu: 0.0.40
codegen_flags: <defaults>
</compile_context>

<pallas_src>
import jax
import jax.numpy as jnp
import numpy as np
from jax.experimental import pallas as pl
from jax.experimental.pallas import tpu as pltpu

_EPS = 1e-8                    # NormalizeOverWindow eps
_LN10 = float(np.log(10.0))    # ExponentialLayer: exp(x * log(10)) == 10**x


def _rnn_head_kernel(x_ref, w_ih_ref, w_hh_ref, b_rnn_ref, w1_ref, b1_ref,
                     w3_ref, b3_ref, o_ref):
    """Fused NormalizeOverWindow + tanh-RNN + (fc1 -> 10**x -> fc3).

    Layout: time-major with the batch tile on the 128-lane axis.
      x_ref : (S, D, TB)    o_ref : (S, O, TB)    weights in PyTorch (out, in) layout.
    All matmuls are W @ X, so the lane axis (TB) is the MXU N dimension.
    """
    s, d, tb = x_ref.shape
    hid = w_hh_ref.shape[0]
    out_dim = w3_ref.shape[0]

    # --- NormalizeOverWindow: mean / unbiased std over the window (time) axis.
    x_all = x_ref[...]                                     # (S, D, TB) f32
    mean = jnp.mean(x_all, axis=0)                         # (D, TB)
    xc = x_all - mean
    var = jnp.sum(xc * xc, axis=0) * jnp.float32(1.0 / (s - 1))
    inv_std = 1.0 / (jnp.sqrt(var) + jnp.float32(_EPS))    # (D, TB)

    # Weights resident across grid steps; lane-broadcasts hoisted out of the loop
    # (JAX does not CSE broadcast_in_dim).
    w_ih = w_ih_ref[...]                                   # (H, D)
    w_hh = w_hh_ref[...]                                   # (H, H)
    w1 = w1_ref[...]                                       # (H, H), ln(10) pre-folded
    w3 = w3_ref[...]                                       # (O, H)
    b_rnn = jnp.broadcast_to(b_rnn_ref[...], (hid, tb))    # b_ih + b_hh
    b1 = jnp.broadcast_to(b1_ref[...], (hid, tb))          # ln(10) pre-folded
    b3 = jnp.broadcast_to(b3_ref[...], (out_dim, tb))

    def step(t, h_prev):
        # normalize this timestep on the fly (keeps live vregs bounded in S)
        xn_t = (x_ref[t] - mean) * inv_std                                   # (D, TB)
        xp = jnp.dot(w_ih, xn_t, preferred_element_type=jnp.float32)         # (H, TB)
        h = jnp.tanh(xp + b_rnn +
                     jnp.dot(w_hh, h_prev, preferred_element_type=jnp.float32))
        # Head fused per timestep; independent of the serial chain, so the scheduler
        # overlaps these matmuls with the next step's h @ W_hh.
        z1 = jnp.dot(w1, h, preferred_element_type=jnp.float32) + b1          # (H, TB)
        e10 = jnp.exp(z1)                                                     # == 10**fc1(h)
        z3 = jnp.dot(w3, e10, preferred_element_type=jnp.float32) + b3        # (O, TB)
        o_ref[t] = z3.astype(o_ref.dtype)                  # full-lane (8,128)-aligned store
        return h

    h0 = jnp.zeros((hid, tb), jnp.float32)
    # Full unroll for short windows; cap the unroll for long ones (vreg pressure).
    jax.lax.fori_loop(0, s, step, h0, unroll=True if s <= 32 else 8)


def _pick_tile_b(bsz):
    # Lane-dense tiles (multiples of 128) and, when possible, >= 2 grid steps so the
    # "parallel" grid axis can shard across v7x's two TensorCores.
    for cand in (512, 256, 128):
        if bsz % cand == 0 and bsz // cand >= 2:
            return cand
    if bsz % 128 == 0:
        return 128
    return bsz     # tiny batch: whole batch as one block (legal: block == full dim)


def simple_lstm_forward(x, params, *, tile_b=None):
    """Pallas TPU forward of SimpleLSTM (hidden_layer='rnn').

    x:       (B, S, D) float32
    params:  (w_ih (H,D), w_hh (H,H), b_ih (H,), b_hh (H,),
              fc1_w (H,H), fc1_b (H,), fc3_w (O,H), fc3_b (O,))
    returns: (B, S, O) float32
    """
    w_ih, w_hh, b_ih, b_hh, w1, b1, w3, b3 = [
        jnp.asarray(p, jnp.float32) for p in params]
    bsz, seq, d = x.shape
    hid = w_hh.shape[0]
    out_dim = w3.shape[0]
    assert seq >= 2, "NormalizeOverWindow uses an unbiased std; requires seq >= 2"

    if tile_b is None:
        tile_b = _pick_tile_b(bsz)
    assert bsz % tile_b == 0 and (tile_b == bsz or tile_b % 128 == 0), (bsz, tile_b)
    grid = (bsz // tile_b,)

    # One-time wrapper-side parameter prep (O(H^2)):
    #   merge RNN biases, fold ln(10) into fc1, reshape biases to lane-broadcast columns.
    #   Weights stay in PyTorch (out, in) layout: batch-on-lanes => matmul is W @ X.
    b_rnn = (b_ih + b_hh).reshape(hid, 1)
    w1s = w1 * jnp.float32(_LN10)
    b1s = (b1 * jnp.float32(_LN10)).reshape(hid, 1)
    b3c = b3.reshape(out_dim, 1)

    # Time-major, batch-on-lanes layout (tiny arrays; layout plumbing only).
    x_tm = jnp.transpose(x.astype(jnp.float32), (1, 2, 0))          # (S, D, B)

    def const_spec(shape):
        return pl.BlockSpec(shape, lambda i: (0,) * len(shape))

    flops = 2 * bsz * seq * (d * hid + 2 * hid * hid + hid * out_dim)
    transcendentals = 2 * bsz * seq * hid                           # tanh + exp
    bytes_accessed = 4 * (bsz * seq * (d + out_dim)
                          + hid * d + 2 * hid * hid + out_dim * hid
                          + 2 * hid + out_dim)

    # Explicit VMEM budget: double-buffered x / out blocks + weights, with headroom.
    blk_bytes = 4 * seq * tile_b * (d + out_dim)
    vmem_limit = int(min(32 * 2**20, max(4 * 2**20, 6 * blk_bytes)))

    out_tm = pl.pallas_call(
        _rnn_head_kernel,
        out_shape=jax.ShapeDtypeStruct((seq, out_dim, bsz), jnp.float32),
        grid=grid,
        in_specs=[
            pl.BlockSpec((seq, d, tile_b), lambda i: (0, 0, i)),     # x  (batch on lanes)
            const_spec((hid, d)),                                    # RNN W_ih
            const_spec((hid, hid)),                                  # RNN W_hh
            const_spec((hid, 1)),                                    # b_ih + b_hh
            const_spec((hid, hid)),                                  # fc1 W * ln10
            const_spec((hid, 1)),                                    # fc1 b * ln10
            const_spec((out_dim, hid)),                              # fc3 W
            const_spec((out_dim, 1)),                                # fc3 b
        ],
        out_specs=pl.BlockSpec((seq, out_dim, tile_b), lambda i: (0, 0, i)),
        compiler_params=pltpu.CompilerParams(
            dimension_semantics=("parallel",),
            vmem_limit_bytes=vmem_limit),
        cost_estimate=pl.CostEstimate(flops=flops,
                                      transcendentals=transcendentals,
                                      bytes_accessed=bytes_accessed),
    )(x_tm, w_ih, w_hh, b_rnn, w1s, b1s, w3, b3c)

    return jnp.transpose(out_tm, (2, 0, 1))                          # (B, S, O)


def _reference_forward(x, params):
    """Plain-JAX mirror of SimpleLSTM.forward (hidden_layer='rnn')."""
    w_ih, w_hh, b_ih, b_hh, w1, b1, w3, b3 = [
        jnp.asarray(p, jnp.float32) for p in params]
    mean = jnp.mean(x, axis=1, keepdims=True)
    xc = x - mean
    var = jnp.sum(xc * xc, axis=1, keepdims=True) / (x.shape[1] - 1)  # torch.std: unbiased
    xn = xc / (jnp.sqrt(var) + _EPS)

    def step(h, x_t):
        h_new = jnp.tanh(x_t @ w_ih.T + b_ih + h @ w_hh.T + b_hh)
        return h_new, h_new

    h0 = jnp.zeros((x.shape[0], w_hh.shape[0]), jnp.float32)
    _, hs = jax.lax.scan(step, h0, jnp.swapaxes(xn, 0, 1))            # (S, B, H)
    rnn_out = jnp.swapaxes(hs, 0, 1)                                  # (B, S, H)
    z1 = rnn_out @ w1.T + b1
    e10 = jnp.exp(z1 * jnp.float32(_LN10))
    return e10 @ w3.T + b3


if __name__ == "__main__":
    # batch, seq(window), input, hidden, output — batch sized so the default tile is a
    # full 128-lane group and the grid keeps 2 parallel steps (v7x: one per TensorCore).
    B, S, D, H, O = 256, 8, 16, 32, 8

    key = jax.random.PRNGKey(0)
    keys = jax.random.split(key, 9)

    def u(k, shape, scale):
        return jax.random.uniform(k, shape, jnp.float32, -scale, scale)

    # Raw "sensor-like" input; NormalizeOverWindow makes the absolute scale irrelevant.
    x = 100.0 + 10.0 * jax.random.normal(keys[0], (B, S, D), jnp.float32)

    k_rnn = 1.0 / np.sqrt(H)                 # PyTorch-style U(-1/sqrt(H), 1/sqrt(H)) init
    params = (
        u(keys[1], (H, D), k_rnn),           # RNN weight_ih_l0
        u(keys[2], (H, H), k_rnn),           # RNN weight_hh_l0
        u(keys[3], (H,), k_rnn),             # RNN bias_ih_l0
        u(keys[4], (H,), k_rnn),             # RNN bias_hh_l0
        u(keys[5], (H, H), k_rnn),           # fc1.weight
        u(keys[6], (H,), k_rnn),             # fc1.bias
        u(keys[7], (O, H), k_rnn),           # fc3.weight
        u(keys[8], (O,), k_rnn),             # fc3.bias
    )

    out = jax.block_until_ready(simple_lstm_forward(x, params))
    assert out.shape == (B, S, O), out.shape

    with jax.default_matmul_precision("float32"):
        ref = jax.block_until_ready(_reference_forward(x, params))

    # Tolerance absorbs MXU f32 multi-pass vs XLA dot rounding, amplified by 10**x.
    max_err = float(jnp.max(jnp.abs(out - ref)))
    assert jnp.allclose(out, ref, atol=2e-2, rtol=2e-2), max_err
    print("KERNEL_OK")
</pallas_src>

<mosaic_0001>
module attributes {stable_mosaic.version = 11 : i64} {
  func.func @_rnn_head_kernel(%arg0: i32, %arg1: memref<8x16x128xf32, #tpu.memory_space<vmem>>, %arg2: memref<32x16xf32, #tpu.memory_space<vmem>>, %arg3: memref<32x32xf32, #tpu.memory_space<vmem>>, %arg4: memref<32x1xf32, #tpu.memory_space<vmem>>, %arg5: memref<32x32xf32, #tpu.memory_space<vmem>>, %arg6: memref<32x1xf32, #tpu.memory_space<vmem>>, %arg7: memref<8x32xf32, #tpu.memory_space<vmem>>, %arg8: memref<8x1xf32, #tpu.memory_space<vmem>>, %arg9: memref<8x8x128xf32, #tpu.memory_space<vmem>>) attributes {dimension_semantics = [#tpu.dimension_semantics<parallel>], iteration_bounds = array<i64: 2>, scalar_prefetch = 0 : i64, scratch_operands = 0 : i64, tpu.core_type = #tpu.core_type<tc>, window_params = [{transform_indices = @transform_0, window_bounds = array<i64: 8, 16, 128>}, {pipeline_mode = #tpu.pipeline_mode<synchronous>, transform_indices = @transform_1, window_bounds = array<i64: 32, 16>}, {pipeline_mode = #tpu.pipeline_mode<synchronous>, transform_indices = @transform_2, window_bounds = array<i64: 32, 32>}, {pipeline_mode = #tpu.pipeline_mode<synchronous>, transform_indices = @transform_3, window_bounds = array<i64: 32, 1>}, {pipeline_mode = #tpu.pipeline_mode<synchronous>, transform_indices = @transform_4, window_bounds = array<i64: 32, 32>}, {pipeline_mode = #tpu.pipeline_mode<synchronous>, transform_indices = @transform_5, window_bounds = array<i64: 32, 1>}, {pipeline_mode = #tpu.pipeline_mode<synchronous>, transform_indices = @transform_6, window_bounds = array<i64: 8, 32>}, {pipeline_mode = #tpu.pipeline_mode<synchronous>, transform_indices = @transform_7, window_bounds = array<i64: 8, 1>}, {transform_indices = @transform_8, window_bounds = array<i64: 8, 8, 128>}]} {
    %c0 = arith.constant 0 : index
    %c0_0 = arith.constant 0 : index
    %c0_1 = arith.constant 0 : index
    %0 = vector.load %arg1[%c0, %c0_0, %c0_1] : memref<8x16x128xf32, #tpu.memory_space<vmem>>, vector<8x16x128xf32>
    %cst = arith.constant dense<0.000000e+00> : vector<16x128xf32>
    %1 = vector.multi_reduction <add>, %0, %cst [0] : vector<8x16x128xf32> to vector<16x128xf32>
    %cst_2 = arith.constant 8.000000e+00 : f32
    %2 = vector.broadcast %cst_2 : f32 to vector<16x128xf32>
    %3 = arith.divf %1, %2 : vector<16x128xf32>
    %4 = vector.shape_cast %3 : vector<16x128xf32> to vector<1x16x128xf32>
    %5 = vector.broadcast %4 : vector<1x16x128xf32> to vector<8x16x128xf32>
    %6 = arith.subf %0, %5 : vector<8x16x128xf32>
    %7 = arith.mulf %6, %6 : vector<8x16x128xf32>
    %cst_3 = arith.constant dense<0.000000e+00> : vector<16x128xf32>
    %8 = vector.multi_reduction <add>, %7, %cst_3 [0] : vector<8x16x128xf32> to vector<16x128xf32>
    %cst_4 = arith.constant 0.142857149 : f32
    %9 = vector.broadcast %cst_4 : f32 to vector<16x128xf32>
    %10 = arith.mulf %8, %9 : vector<16x128xf32>
    %11 = math.sqrt %10 : vector<16x128xf32>
    %cst_5 = arith.constant 9.99999993E-9 : f32
    %12 = vector.broadcast %cst_5 : f32 to vector<16x128xf32>
    %13 = arith.addf %11, %12 : vector<16x128xf32>
    %cst_6 = arith.constant 1.000000e+00 : f32
    %14 = vector.broadcast %cst_6 : f32 to vector<16x128xf32>
    %15 = arith.divf %14, %13 : vector<16x128xf32>
    %c0_7 = arith.constant 0 : index
    %c0_8 = arith.constant 0 : index
    %16 = vector.load %arg2[%c0_7, %c0_8] : memref<32x16xf32, #tpu.memory_space<vmem>>, vector<32x16xf32>
    %c0_9 = arith.constant 0 : index
    %c0_10 = arith.constant 0 : index
    %17 = vector.load %arg3[%c0_9, %c0_10] : memref<32x32xf32, #tpu.memory_space<vmem>>, vector<32x32xf32>
    %c0_11 = arith.constant 0 : index
    %c0_12 = arith.constant 0 : index
    %18 = vector.load %arg5[%c0_11, %c0_12] : memref<32x32xf32, #tpu.memory_space<vmem>>, vector<32x32xf32>
    %c0_13 = arith.constant 0 : index
    %c0_14 = arith.constant 0 : index
    %19 = vector.load %arg7[%c0_13, %c0_14] : memref<8x32xf32, #tpu.memory_space<vmem>>, vector<8x32xf32>
    %c0_15 = arith.constant 0 : index
    %c0_16 = arith.constant 0 : index
    %20 = vector.load %arg4[%c0_15, %c0_16] : memref<32x1xf32, #tpu.memory_space<vmem>>, vector<32x1xf32>
    %21 = vector.shape_cast %20 : vector<32x1xf32> to vector<32x1xf32>
    %22 = vector.broadcast %21 : vector<32x1xf32> to vector<32x128xf32>
    %c0_17 = arith.constant 0 : index
    %c0_18 = arith.constant 0 : index
    %23 = vector.load %arg6[%c0_17, %c0_18] : memref<32x1xf32, #tpu.memory_space<vmem>>, vector<32x1xf32>
    %24 = vector.shape_cast %23 : vector<32x1xf32> to vector<32x1xf32>
    %25 = vector.broadcast %24 : vector<32x1xf32> to vector<32x128xf32>
    %c0_19 = arith.constant 0 : index
    %c0_20 = arith.constant 0 : index
    %26 = vector.load %arg8[%c0_19, %c0_20] : memref<8x1xf32, #tpu.memory_space<vmem>>, vector<8x1xf32>
    %27 = vector.shape_cast %26 : vector<8x1xf32> to vector<8x1xf32>
    %28 = vector.broadcast %27 : vector<8x1xf32> to vector<8x128xf32>
    %cst_21 = arith.constant 0.000000e+00 : f32
    %29 = vector.broadcast %cst_21 : f32 to vector<32x128xf32>
    %c0_i32 = arith.constant 0 : i32
    %30 = arith.index_cast %c0_i32 : i32 to index
    %c0_22 = arith.constant 0 : index
    %c0_23 = arith.constant 0 : index
    %31 = vector.load %arg1[%30, %c0_22, %c0_23] : memref<8x16x128xf32, #tpu.memory_space<vmem>>, vector<1x16x128xf32>
    %32 = vector.shape_cast %31 : vector<1x16x128xf32> to vector<16x128xf32>
    %33 = arith.subf %32, %3 : vector<16x128xf32>
    %34 = arith.mulf %33, %15 : vector<16x128xf32>
    %cst_24 = arith.constant dense<0.000000e+00> : vector<32x128xf32>
    %35 = tpu.matmul %16, %34, %cst_24 {dimension_numbers = #tpu.dot_dimension_numbers<[1], [0], [0], [1], [0, 0, 1, 1], [], []>} : vector<32x16xf32>, vector<16x128xf32>, vector<32x128xf32> -> vector<32x128xf32>
    %36 = arith.addf %35, %22 : vector<32x128xf32>
    %cst_25 = arith.constant dense<0.000000e+00> : vector<32x128xf32>
    %37 = tpu.matmul %17, %29, %cst_25 {dimension_numbers = #tpu.dot_dimension_numbers<[1], [0], [0], [1], [0, 0, 1, 1], [], []>} : vector<32x32xf32>, vector<32x128xf32>, vector<32x128xf32> -> vector<32x128xf32>
    %38 = arith.addf %36, %37 : vector<32x128xf32>
    %39 = math.tanh %38 : vector<32x128xf32>
    %cst_26 = arith.constant dense<0.000000e+00> : vector<32x128xf32>
    %40 = tpu.matmul %18, %39, %cst_26 {dimension_numbers = #tpu.dot_dimension_numbers<[1], [0], [0], [1], [0, 0, 1, 1], [], []>} : vector<32x32xf32>, vector<32x128xf32>, vector<32x128xf32> -> vector<32x128xf32>
    %41 = arith.addf %40, %25 : vector<32x128xf32>
    %42 = math.exp %41 : vector<32x128xf32>
    %cst_27 = arith.constant dense<0.000000e+00> : vector<8x128xf32>
    %43 = tpu.matmul %19, %42, %cst_27 {dimension_numbers = #tpu.dot_dimension_numbers<[1], [0], [0], [1], [0, 0, 1, 1], [], []>} : vector<8x32xf32>, vector<32x128xf32>, vector<8x128xf32> -> vector<8x128xf32>
    %44 = arith.addf %43, %28 : vector<8x128xf32>
    %45 = arith.index_cast %c0_i32 : i32 to index
    %c0_28 = arith.constant 0 : index
    %c0_29 = arith.constant 0 : index
    %46 = vector.load %arg9[%45, %c0_28, %c0_29] : memref<8x8x128xf32, #tpu.memory_space<vmem>>, vector<1x8x128xf32>
    %47 = vector.shape_cast %46 : vector<1x8x128xf32> to vector<8x128xf32>
    %48 = vector.shape_cast %44 : vector<8x128xf32> to vector<1x8x128xf32>
    tpu.vector_store %arg9[%45, %c0_28, %c0_29], %48 {strides = array<i32>} : memref<8x8x128xf32, #tpu.memory_space<vmem>>, vector<1x8x128xf32>,
    %c1_i32 = arith.constant 1 : i32
    %49 = arith.index_cast %c1_i32 : i32 to index
    %c0_30 = arith.constant 0 : index
    %c0_31 = arith.constant 0 : index
    %50 = vector.load %arg1[%49, %c0_30, %c0_31] : memref<8x16x128xf32, #tpu.memory_space<vmem>>, vector<1x16x128xf32>
    %51 = vector.shape_cast %50 : vector<1x16x128xf32> to vector<16x128xf32>
    %52 = arith.subf %51, %3 : vector<16x128xf32>
    %53 = arith.mulf %52, %15 : vector<16x128xf32>
    %cst_32 = arith.constant dense<0.000000e+00> : vector<32x128xf32>
    %54 = tpu.matmul %16, %53, %cst_32 {dimension_numbers = #tpu.dot_dimension_numbers<[1], [0], [0], [1], [0, 0, 1, 1], [], []>} : vector<32x16xf32>, vector<16x128xf32>, vector<32x128xf32> -> vector<32x128xf32>
    %55 = arith.addf %54, %22 : vector<32x128xf32>
    %cst_33 = arith.constant dense<0.000000e+00> : vector<32x128xf32>
    %56 = tpu.matmul %17, %39, %cst_33 {dimension_numbers = #tpu.dot_dimension_numbers<[1], [0], [0], [1], [0, 0, 1, 1], [], []>} : vector<32x32xf32>, vector<32x128xf32>, vector<32x128xf32> -> vector<32x128xf32>
    %57 = arith.addf %55, %56 : vector<32x128xf32>
    %58 = math.tanh %57 : vector<32x128xf32>
    %cst_34 = arith.constant dense<0.000000e+00> : vector<32x128xf32>
    %59 = tpu.matmul %18, %58, %cst_34 {dimension_numbers = #tpu.dot_dimension_numbers<[1], [0], [0], [1], [0, 0, 1, 1], [], []>} : vector<32x32xf32>, vector<32x128xf32>, vector<32x128xf32> -> vector<32x128xf32>
    %60 = arith.addf %59, %25 : vector<32x128xf32>
    %61 = math.exp %60 : vector<32x128xf32>
    %cst_35 = arith.constant dense<0.000000e+00> : vector<8x128xf32>
    %62 = tpu.matmul %19, %61, %cst_35 {dimension_numbers = #tpu.dot_dimension_numbers<[1], [0], [0], [1], [0, 0, 1, 1], [], []>} : vector<8x32xf32>, vector<32x128xf32>, vector<8x128xf32> -> vector<8x128xf32>
    %63 = arith.addf %62, %28 : vector<8x128xf32>
    %64 = arith.index_cast %c1_i32 : i32 to index
    %c0_36 = arith.constant 0 : index
    %c0_37 = arith.constant 0 : index
    %65 = vector.load %arg9[%64, %c0_36, %c0_37] : memref<8x8x128xf32, #tpu.memory_space<vmem>>, vector<1x8x128xf32>
    %66 = vector.shape_cast %65 : vector<1x8x128xf32> to vector<8x128xf32>
    %67 = vector.shape_cast %63 : vector<8x128xf32> to vector<1x8x128xf32>
    tpu.vector_store %arg9[%64, %c0_36, %c0_37], %67 {strides = array<i32>} : memref<8x8x128xf32, #tpu.memory_space<vmem>>, vector<1x8x128xf32>,
    %c2_i32 = arith.constant 2 : i32
    %68 = arith.index_cast %c2_i32 : i32 to index
    %c0_38 = arith.constant 0 : index
    %c0_39 = arith.constant 0 : index
    %69 = vector.load %arg1[%68, %c0_38, %c0_39] : memref<8x16x128xf32, #tpu.memory_space<vmem>>, vector<1x16x128xf32>
    %70 = vector.shape_cast %69 : vector<1x16x128xf32> to vector<16x128xf32>
    %71 = arith.subf %70, %3 : vector<16x128xf32>
    %72 = arith.mulf %71, %15 : vector<16x128xf32>
    %cst_40 = arith.constant dense<0.000000e+00> : vector<32x128xf32>
    %73 = tpu.matmul %16, %72, %cst_40 {dimension_numbers = #tpu.dot_dimension_numbers<[1], [0], [0], [1], [0, 0, 1, 1], [], []>} : vector<32x16xf32>, vector<16x128xf32>, vector<32x128xf32> -> vector<32x128xf32>
    %74 = arith.addf %73, %22 : vector<32x128xf32>
    %cst_41 = arith.constant dense<0.000000e+00> : vector<32x128xf32>
    %75 = tpu.matmul %17, %58, %cst_41 {dimension_numbers = #tpu.dot_dimension_numbers<[1], [0], [0], [1], [0, 0, 1, 1], [], []>} : vector<32x32xf32>, vector<32x128xf32>, vector<32x128xf32> -> vector<32x128xf32>
    %76 = arith.addf %74, %75 : vector<32x128xf32>
    %77 = math.tanh %76 : vector<32x128xf32>
    %cst_42 = arith.constant dense<0.000000e+00> : vector<32x128xf32>
    %78 = tpu.matmul %18, %77, %cst_42 {dimension_numbers = #tpu.dot_dimension_numbers<[1], [0], [0], [1], [0, 0, 1, 1], [], []>} : vector<32x32xf32>, vector<32x128xf32>, vector<32x128xf32> -> vector<32x128xf32>
    %79 = arith.addf %78, %25 : vector<32x128xf32>
    %80 = math.exp %79 : vector<32x128xf32>
    %cst_43 = arith.constant dense<0.000000e+00> : vector<8x128xf32>
    %81 = tpu.matmul %19, %80, %cst_43 {dimension_numbers = #tpu.dot_dimension_numbers<[1], [0], [0], [1], [0, 0, 1, 1], [], []>} : vector<8x32xf32>, vector<32x128xf32>, vector<8x128xf32> -> vector<8x128xf32>
    %82 = arith.addf %81, %28 : vector<8x128xf32>
    %83 = arith.index_cast %c2_i32 : i32 to index
    %c0_44 = arith.constant 0 : index
    %c0_45 = arith.constant 0 : index
    %84 = vector.load %arg9[%83, %c0_44, %c0_45] : memref<8x8x128xf32, #tpu.memory_space<vmem>>, vector<1x8x128xf32>
    %85 = vector.shape_cast %84 : vector<1x8x128xf32> to vector<8x128xf32>
    %86 = vector.shape_cast %82 : vector<8x128xf32> to vector<1x8x128xf32>
    tpu.vector_store %arg9[%83, %c0_44, %c0_45], %86 {strides = array<i32>} : memref<8x8x128xf32, #tpu.memory_space<vmem>>, vector<1x8x128xf32>,
    %c3_i32 = arith.constant 3 : i32
    %87 = arith.index_cast %c3_i32 : i32 to index
    %c0_46 = arith.constant 0 : index
    %c0_47 = arith.constant 0 : index
    %88 = vector.load %arg1[%87, %c0_46, %c0_47] : memref<8x16x128xf32, #tpu.memory_space<vmem>>, vector<1x16x128xf32>
    %89 = vector.shape_cast %88 : vector<1x16x128xf32> to vector<16x128xf32>
    %90 = arith.subf %89, %3 : vector<16x128xf32>
    %91 = arith.mulf %90, %15 : vector<16x128xf32>
    %cst_48 = arith.constant dense<0.000000e+00> : vector<32x128xf32>
    %92 = tpu.matmul %16, %91, %cst_48 {dimension_numbers = #tpu.dot_dimension_numbers<[1], [0], [0], [1], [0, 0, 1, 1], [], []>} : vector<32x16xf32>, vector<16x128xf32>, vector<32x128xf32> -> vector<32x128xf32>
    %93 = arith.addf %92, %22 : vector<32x128xf32>
    %cst_49 = arith.constant dense<0.000000e+00> : vector<32x128xf32>
    %94 = tpu.matmul %17, %77, %cst_49 {dimension_numbers = #tpu.dot_dimension_numbers<[1], [0], [0], [1], [0, 0, 1, 1], [], []>} : vector<32x32xf32>, vector<32x128xf32>, vector<32x128xf32> -> vector<32x128xf32>
    %95 = arith.addf %93, %94 : vector<32x128xf32>
    %96 = math.tanh %95 : vector<32x128xf32>
    %cst_50 = arith.constant dense<0.000000e+00> : vector<32x128xf32>
    %97 = tpu.matmul %18, %96, %cst_50 {dimension_numbers = #tpu.dot_dimension_numbers<[1], [0], [0], [1], [0, 0, 1, 1], [], []>} : vector<32x32xf32>, vector<32x128xf32>, vector<32x128xf32> -> vector<32x128xf32>
    %98 = arith.addf %97, %25 : vector<32x128xf32>
    %99 = math.exp %98 : vector<32x128xf32>
    %cst_51 = arith.constant dense<0.000000e+00> : vector<8x128xf32>
    %100 = tpu.matmul %19, %99, %cst_51 {dimension_numbers = #tpu.dot_dimension_numbers<[1], [0], [0], [1], [0, 0, 1, 1], [], []>} : vector<8x32xf32>, vector<32x128xf32>, vector<8x128xf32> -> vector<8x128xf32>
    %101 = arith.addf %100, %28 : vector<8x128xf32>
    %102 = arith.index_cast %c3_i32 : i32 to index
    %c0_52 = arith.constant 0 : index
    %c0_53 = arith.constant 0 : index
    %103 = vector.load %arg9[%102, %c0_52, %c0_53] : memref<8x8x128xf32, #tpu.memory_space<vmem>>, vector<1x8x128xf32>
    %104 = vector.shape_cast %103 : vector<1x8x128xf32> to vector<8x128xf32>
    %105 = vector.shape_cast %101 : vector<8x128xf32> to vector<1x8x128xf32>
    tpu.vector_store %arg9[%102, %c0_52, %c0_53], %105 {strides = array<i32>} : memref<8x8x128xf32, #tpu.memory_space<vmem>>, vector<1x8x128xf32>,
    %c4_i32 = arith.constant 4 : i32
    %106 = arith.index_cast %c4_i32 : i32 to index
    %c0_54 = arith.constant 0 : index
    %c0_55 = arith.constant 0 : index
    %107 = vector.load %arg1[%106, %c0_54, %c0_55] : memref<8x16x128xf32, #tpu.memory_space<vmem>>, vector<1x16x128xf32>
    %108 = vector.shape_cast %107 : vector<1x16x128xf32> to vector<16x128xf32>
    %109 = arith.subf %108, %3 : vector<16x128xf32>
    %110 = arith.mulf %109, %15 : vector<16x128xf32>
    %cst_56 = arith.constant dense<0.000000e+00> : vector<32x128xf32>
    %111 = tpu.matmul %16, %110, %cst_56 {dimension_numbers = #tpu.dot_dimension_numbers<[1], [0], [0], [1], [0, 0, 1, 1], [], []>} : vector<32x16xf32>, vector<16x128xf32>, vector<32x128xf32> -> vector<32x128xf32>
    %112 = arith.addf %111, %22 : vector<32x128xf32>
    %cst_57 = arith.constant dense<0.000000e+00> : vector<32x128xf32>
    %113 = tpu.matmul %17, %96, %cst_57 {dimension_numbers = #tpu.dot_dimension_numbers<[1], [0], [0], [1], [0, 0, 1, 1], [], []>} : vector<32x32xf32>, vector<32x128xf32>, vector<32x128xf32> -> vector<32x128xf32>
    %114 = arith.addf %112, %113 : vector<32x128xf32>
    %115 = math.tanh %114 : vector<32x128xf32>
    %cst_58 = arith.constant dense<0.000000e+00> : vector<32x128xf32>
    %116 = tpu.matmul %18, %115, %cst_58 {dimension_numbers = #tpu.dot_dimension_numbers<[1], [0], [0], [1], [0, 0, 1, 1], [], []>} : vector<32x32xf32>, vector<32x128xf32>, vector<32x128xf32> -> vector<32x128xf32>
    %117 = arith.addf %116, %25 : vector<32x128xf32>
    %118 = math.exp %117 : vector<32x128xf32>
    %cst_59 = arith.constant dense<0.000000e+00> : vector<8x128xf32>
    %119 = tpu.matmul %19, %118, %cst_59 {dimension_numbers = #tpu.dot_dimension_numbers<[1], [0], [0], [1], [0, 0, 1, 1], [], []>} : vector<8x32xf32>, vector<32x128xf32>, vector<8x128xf32> -> vector<8x128xf32>
    %120 = arith.addf %119, %28 : vector<8x128xf32>
    %121 = arith.index_cast %c4_i32 : i32 to index
    %c0_60 = arith.constant 0 : index
    %c0_61 = arith.constant 0 : index
    %122 = vector.load %arg9[%121, %c0_60, %c0_61] : memref<8x8x128xf32, #tpu.memory_space<vmem>>, vector<1x8x128xf32>
    %123 = vector.shape_cast %122 : vector<1x8x128xf32> to vector<8x128xf32>
    %124 = vector.shape_cast %120 : vector<8x128xf32> to vector<1x8x128xf32>
    tpu.vector_store %arg9[%121, %c0_60, %c0_61], %124 {strides = array<i32>} : memref<8x8x128xf32, #tpu.memory_space<vmem>>, vector<1x8x128xf32>,
    %c5_i32 = arith.constant 5 : i32
    %125 = arith.index_cast %c5_i32 : i32 to index
    %c0_62 = arith.constant 0 : index
    %c0_63 = arith.constant 0 : index
    %126 = vector.load %arg1[%125, %c0_62, %c0_63] : memref<8x16x128xf32, #tpu.memory_space<vmem>>, vector<1x16x128xf32>
    %127 = vector.shape_cast %126 : vector<1x16x128xf32> to vector<16x128xf32>
    %128 = arith.subf %127, %3 : vector<16x128xf32>
    %129 = arith.mulf %128, %15 : vector<16x128xf32>
    %cst_64 = arith.constant dense<0.000000e+00> : vector<32x128xf32>
    %130 = tpu.matmul %16, %129, %cst_64 {dimension_numbers = #tpu.dot_dimension_numbers<[1], [0], [0], [1], [0, 0, 1, 1], [], []>} : vector<32x16xf32>, vector<16x128xf32>, vector<32x128xf32> -> vector<32x128xf32>
    %131 = arith.addf %130, %22 : vector<32x128xf32>
    %cst_65 = arith.constant dense<0.000000e+00> : vector<32x128xf32>
    %132 = tpu.matmul %17, %115, %cst_65 {dimension_numbers = #tpu.dot_dimension_numbers<[1], [0], [0], [1], [0, 0, 1, 1], [], []>} : vector<32x32xf32>, vector<32x128xf32>, vector<32x128xf32> -> vector<32x128xf32>
    %133 = arith.addf %131, %132 : vector<32x128xf32>
    %134 = math.tanh %133 : vector<32x128xf32>
    %cst_66 = arith.constant dense<0.000000e+00> : vector<32x128xf32>
    %135 = tpu.matmul %18, %134, %cst_66 {dimension_numbers = #tpu.dot_dimension_numbers<[1], [0], [0], [1], [0, 0, 1, 1], [], []>} : vector<32x32xf32>, vector<32x128xf32>, vector<32x128xf32> -> vector<32x128xf32>
    %136 = arith.addf %135, %25 : vector<32x128xf32>
    %137 = math.exp %136 : vector<32x128xf32>
    %cst_67 = arith.constant dense<0.000000e+00> : vector<8x128xf32>
    %138 = tpu.matmul %19, %137, %cst_67 {dimension_numbers = #tpu.dot_dimension_numbers<[1], [0], [0], [1], [0, 0, 1, 1], [], []>} : vector<8x32xf32>, vector<32x128xf32>, vector<8x128xf32> -> vector<8x128xf32>
    %139 = arith.addf %138, %28 : vector<8x128xf32>
    %140 = arith.index_cast %c5_i32 : i32 to index
    %c0_68 = arith.constant 0 : index
    %c0_69 = arith.constant 0 : index
    %141 = vector.load %arg9[%140, %c0_68, %c0_69] : memref<8x8x128xf32, #tpu.memory_space<vmem>>, vector<1x8x128xf32>
    %142 = vector.shape_cast %141 : vector<1x8x128xf32> to vector<8x128xf32>
    %143 = vector.shape_cast %139 : vector<8x128xf32> to vector<1x8x128xf32>
    tpu.vector_store %arg9[%140, %c0_68, %c0_69], %143 {strides = array<i32>} : memref<8x8x128xf32, #tpu.memory_space<vmem>>, vector<1x8x128xf32>,
    %c6_i32 = arith.constant 6 : i32
    %144 = arith.index_cast %c6_i32 : i32 to index
    %c0_70 = arith.constant 0 : index
    %c0_71 = arith.constant 0 : index
    %145 = vector.load %arg1[%144, %c0_70, %c0_71] : memref<8x16x128xf32, #tpu.memory_space<vmem>>, vector<1x16x128xf32>
    %146 = vector.shape_cast %145 : vector<1x16x128xf32> to vector<16x128xf32>
    %147 = arith.subf %146, %3 : vector<16x128xf32>
    %148 = arith.mulf %147, %15 : vector<16x128xf32>
    %cst_72 = arith.constant dense<0.000000e+00> : vector<32x128xf32>
    %149 = tpu.matmul %16, %148, %cst_72 {dimension_numbers = #tpu.dot_dimension_numbers<[1], [0], [0], [1], [0, 0, 1, 1], [], []>} : vector<32x16xf32>, vector<16x128xf32>, vector<32x128xf32> -> vector<32x128xf32>
    %150 = arith.addf %149, %22 : vector<32x128xf32>
    %cst_73 = arith.constant dense<0.000000e+00> : vector<32x128xf32>
    %151 = tpu.matmul %17, %134, %cst_73 {dimension_numbers = #tpu.dot_dimension_numbers<[1], [0], [0], [1], [0, 0, 1, 1], [], []>} : vector<32x32xf32>, vector<32x128xf32>, vector<32x128xf32> -> vector<32x128xf32>
    %152 = arith.addf %150, %151 : vector<32x128xf32>
    %153 = math.tanh %152 : vector<32x128xf32>
    %cst_74 = arith.constant dense<0.000000e+00> : vector<32x128xf32>
    %154 = tpu.matmul %18, %153, %cst_74 {dimension_numbers = #tpu.dot_dimension_numbers<[1], [0], [0], [1], [0, 0, 1, 1], [], []>} : vector<32x32xf32>, vector<32x128xf32>, vector<32x128xf32> -> vector<32x128xf32>
    %155 = arith.addf %154, %25 : vector<32x128xf32>
    %156 = math.exp %155 : vector<32x128xf32>
    %cst_75 = arith.constant dense<0.000000e+00> : vector<8x128xf32>
    %157 = tpu.matmul %19, %156, %cst_75 {dimension_numbers = #tpu.dot_dimension_numbers<[1], [0], [0], [1], [0, 0, 1, 1], [], []>} : vector<8x32xf32>, vector<32x128xf32>, vector<8x128xf32> -> vector<8x128xf32>
    %158 = arith.addf %157, %28 : vector<8x128xf32>
    %159 = arith.index_cast %c6_i32 : i32 to index
    %c0_76 = arith.constant 0 : index
    %c0_77 = arith.constant 0 : index
    %160 = vector.load %arg9[%159, %c0_76, %c0_77] : memref<8x8x128xf32, #tpu.memory_space<vmem>>, vector<1x8x128xf32>
    %161 = vector.shape_cast %160 : vector<1x8x128xf32> to vector<8x128xf32>
    %162 = vector.shape_cast %158 : vector<8x128xf32> to vector<1x8x128xf32>
    tpu.vector_store %arg9[%159, %c0_76, %c0_77], %162 {strides = array<i32>} : memref<8x8x128xf32, #tpu.memory_space<vmem>>, vector<1x8x128xf32>,
    %c7_i32 = arith.constant 7 : i32
    %163 = arith.index_cast %c7_i32 : i32 to index
    %c0_78 = arith.constant 0 : index
    %c0_79 = arith.constant 0 : index
    %164 = vector.load %arg1[%163, %c0_78, %c0_79] : memref<8x16x128xf32, #tpu.memory_space<vmem>>, vector<1x16x128xf32>
    %165 = vector.shape_cast %164 : vector<1x16x128xf32> to vector<16x128xf32>
    %166 = arith.subf %165, %3 : vector<16x128xf32>
    %167 = arith.mulf %166, %15 : vector<16x128xf32>
    %cst_80 = arith.constant dense<0.000000e+00> : vector<32x128xf32>
    %168 = tpu.matmul %16, %167, %cst_80 {dimension_numbers = #tpu.dot_dimension_numbers<[1], [0], [0], [1], [0, 0, 1, 1], [], []>} : vector<32x16xf32>, vector<16x128xf32>, vector<32x128xf32> -> vector<32x128xf32>
    %169 = arith.addf %168, %22 : vector<32x128xf32>
    %cst_81 = arith.constant dense<0.000000e+00> : vector<32x128xf32>
    %170 = tpu.matmul %17, %153, %cst_81 {dimension_numbers = #tpu.dot_dimension_numbers<[1], [0], [0], [1], [0, 0, 1, 1], [], []>} : vector<32x32xf32>, vector<32x128xf32>, vector<32x128xf32> -> vector<32x128xf32>
    %171 = arith.addf %169, %170 : vector<32x128xf32>
    %172 = math.tanh %171 : vector<32x128xf32>
    %cst_82 = arith.constant dense<0.000000e+00> : vector<32x128xf32>
    %173 = tpu.matmul %18, %172, %cst_82 {dimension_numbers = #tpu.dot_dimension_numbers<[1], [0], [0], [1], [0, 0, 1, 1], [], []>} : vector<32x32xf32>, vector<32x128xf32>, vector<32x128xf32> -> vector<32x128xf32>
    %174 = arith.addf %173, %25 : vector<32x128xf32>
    %175 = math.exp %174 : vector<32x128xf32>
    %cst_83 = arith.constant dense<0.000000e+00> : vector<8x128xf32>
    %176 = tpu.matmul %19, %175, %cst_83 {dimension_numbers = #tpu.dot_dimension_numbers<[1], [0], [0], [1], [0, 0, 1, 1], [], []>} : vector<8x32xf32>, vector<32x128xf32>, vector<8x128xf32> -> vector<8x128xf32>
    %177 = arith.addf %176, %28 : vector<8x128xf32>
    %178 = arith.index_cast %c7_i32 : i32 to index
    %c0_84 = arith.constant 0 : index
    %c0_85 = arith.constant 0 : index
    %179 = vector.load %arg9[%178, %c0_84, %c0_85] : memref<8x8x128xf32, #tpu.memory_space<vmem>>, vector<1x8x128xf32>
    %180 = vector.shape_cast %179 : vector<1x8x128xf32> to vector<8x128xf32>
    %181 = vector.shape_cast %177 : vector<8x128xf32> to vector<1x8x128xf32>
    tpu.vector_store %arg9[%178, %c0_84, %c0_85], %181 {strides = array<i32>} : memref<8x8x128xf32, #tpu.memory_space<vmem>>, vector<1x8x128xf32>,
    %c8_i32 = arith.constant 8 : i32
    return
  }
  func.func @transform_0(%arg0: i32) -> (i32, i32, i32) {
    %c0_i32 = arith.constant 0 : i32
    %c0_i32_0 = arith.constant 0 : i32
    %c0_i32_1 = arith.constant 0 : i32
    return %c0_i32, %c0_i32_0, %arg0 : i32, i32, i32
  }
  func.func @transform_1(%arg0: i32) -> (i32, i32) {
    %c0_i32 = arith.constant 0 : i32
    %c0_i32_0 = arith.constant 0 : i32
    %c0_i32_1 = arith.constant 0 : i32
    return %c0_i32, %c0_i32_0 : i32, i32
  }
  func.func @transform_2(%arg0: i32) -> (i32, i32) {
    %c0_i32 = arith.constant 0 : i32
    %c0_i32_0 = arith.constant 0 : i32
    %c0_i32_1 = arith.constant 0 : i32
    return %c0_i32, %c0_i32_0 : i32, i32
  }
  func.func @transform_3(%arg0: i32) -> (i32, i32) {
    %c0_i32 = arith.constant 0 : i32
    %c0_i32_0 = arith.constant 0 : i32
    %c0_i32_1 = arith.constant 0 : i32
    return %c0_i32, %c0_i32_0 : i32, i32
  }
  func.func @transform_4(%arg0: i32) -> (i32, i32) {
    %c0_i32 = arith.constant 0 : i32
    %c0_i32_0 = arith.constant 0 : i32
    %c0_i32_1 = arith.constant 0 : i32
    return %c0_i32, %c0_i32_0 : i32, i32
  }
  func.func @transform_5(%arg0: i32) -> (i32, i32) {
    %c0_i32 = arith.constant 0 : i32
    %c0_i32_0 = arith.constant 0 : i32
    %c0_i32_1 = arith.constant 0 : i32
    return %c0_i32, %c0_i32_0 : i32, i32
  }
  func.func @transform_6(%arg0: i32) -> (i32, i32) {
    %c0_i32 = arith.constant 0 : i32
    %c0_i32_0 = arith.constant 0 : i32
    %c0_i32_1 = arith.constant 0 : i32
    return %c0_i32, %c0_i32_0 : i32, i32
  }
  func.func @transform_7(%arg0: i32) -> (i32, i32) {
    %c0_i32 = arith.constant 0 : i32
    %c0_i32_0 = arith.constant 0 : i32
    %c0_i32_1 = arith.constant 0 : i32
    return %c0_i32, %c0_i32_0 : i32, i32
  }
  func.func @transform_8(%arg0: i32) -> (i32, i32, i32) {
    %c0_i32 = arith.constant 0 : i32
    %c0_i32_0 = arith.constant 0 : i32
    %c0_i32_1 = arith.constant 0 : i32
    return %c0_i32, %c0_i32_0, %arg0 : i32, i32, i32
  }
}

</mosaic_0001>

<bundles_post_ra>
// kernel: tpu_custom_call.1
= control target key start
LH: loop header
LB: loop body
LE: loop exit
PB: predicated region body
PF: predicated region fallthrough
CT: control target
= control target key end

     0   :  { %13 = vsyncpa [#allocation3], 0  ;;  %s5512_s0 = inlined_call_operand.hbm [shape: f32[8,16,256], index: 0, kind: input, shape index: {}]   ;;  %s5513_s1 = inlined_call_operand.vmem [shape: f32[32,16], index: 1, kind: input, shape index: {}]   ;;  %s5514_s2 = inlined_call_operand.vmem [shape: f32[32,32], index: 2, kind: input, shape index: {}]   ;;  %s5515_s3 = inlined_call_operand.vmem [shape: f32[32,1], index: 3, kind: input, shape index: {}]   ;;  %s5516_s4 = inlined_call_operand.vmem [shape: f32[32,32], index: 4, kind: input, shape index: {}]   ;;  %s5517_s5 = inlined_call_operand.vmem [shape: f32[32,1], index: 5, kind: input, shape index: {}]   ;;  %s5518_s6 = inlined_call_operand.vmem [shape: f32[8,32], index: 6, kind: input, shape index: {}]   ;;  %s5519_s7 = inlined_call_operand.vmem [shape: f32[8,1], index: 7, kind: input, shape index: {}]   ;;  %s5520_s8 = inlined_call_operand.hbm [shape: f32[8,8,256], index: 8, kind: output, shape index: {}]  }
   0x1   :  { %15 = vsyncpa [#allocation3 + $0x1], 0 }
   0x2   :  { %16 = vsyncpa [#allocation4], 0 }
   0x3   :  { %18 = vsyncpa [#allocation4 + $0x1], 0  ;;  %s4770_s27 = smov 0   ;;  %s4772_s28 = smov 0  }
   0x4   :  { %s4774_s29 = smov 0   ;;  %s4776_s30 = smov 0  }
   0x5 LB: > { %s4791_s9 = sadd.s32 4294967295, %s4711_s30   ;;  %s3416_s10 = sadd.s32 4294967294, %s4711_s30   ;;  %s4711_s30 = sphi %s4776_s30, %s5534_s30   ;;  %s4707_s29 = sphi %s4774_s29, %s5533_s29   ;;  %s4703_s28 = sphi %s4772_s28, %s5532_s28   ;;  %s4699_s27 = sphi %s4770_s27, %s5531_s27  }
   0x6   : > { %s4795_s11 = sadd.s32 1, %s4711_s30   ;;  %s31_s12 = sadd.s32 1, %s4707_s29 }
   0x7   : > { %s28_s13 = ssub.s32 %s4711_s30, %s4795_s11  ;;  %p38_p0 = scmp.ne.s32.totalorder %s4707_s29, %s4703_s28 }
   0x8   : > { %p29_p1 = scmp.eq.s32.totalorder %s28_s13, 0  ;;  %p39_p2 = scmp.eq.s32.totalorder %s4711_s30, 0 }
   0x9   : > { %p44_p3 = scmp.ne.s32.totalorder %s4703_s28, %s4699_s27  ;;  %p45_p4 = scmp.eq.s32.totalorder %s4791_s9, 0 }
   0xa   : > { %s4807_s14 = scalar_select %p29_p1, %s4707_s29, %s31_s12  }
   0xb   : > { %p4809_p5 = por %p39_p2, %p38_p0  ;;  %p4813_p6 = por %p45_p4, %p44_p3 }
   0xc   : > { %p215_p7 = scmp.eq.s32.totalorder %s4791_s9, 1  ;;  %p221_p8 = scmp.eq.s32.totalorder %s3416_s10, 1 }
   0xd   : > { %p4428_p10 = scmp.lt.s32.totalorder %s4711_s30, 2  ;;  %s262_s19 = sand.u32 1, %s4707_s29  }
   0xe   : > { %p4820_p11 = por %p215_p7, %p38_p0  ;;  %p4824_p12 = por %p221_p8, %p44_p3 }
   0xf   : > { %s3420_s20 = sshll.u32 %s4711_s30, 7  ;;  %s3419_s21 = sshll.u32 %s262_s19, 7 }
  0x10   : > { %s5524_s17 = scalar_select %p4820_p11, 1, 0 }
  0x11   : > { %s5525_s18 = scalar_select %p4824_p12, 1, 0 }
  0x12   : > { %s4833_s24 = scalar_lea.hbm %s5512_s0, %s3420_s20  ;;  %s266_s25 = scalar_lea.vmem [#allocation2], %s3419_s21 }
  0x13   : > { %s272_s26 = sshll.u32 %s266_s25, 4  ;;  %p4837_p13 = pnand %p4428_p10, %p4809_p5  ;;  %s4841_s26 = int_to_ptr.vmem [resolvable:$true] %s272_s26 }
  0x14   : > { %s4844_s12 = scalar_lea.sflag [#allocation3], %s262_s19  ;;  %s4615_s13 = scalar_lea.hbm %s4833_s24, 2048 }
  0x15   : > { %p4616_p1 = scmp.ne.s32.totalorder %s4833_s24, %s4615_s13  ;;  %p4617_p2 = pneg %p4837_p13 }
  0x16   : > { %s4620_s21 = scalar_lea.hbm %s5512_s0, 4096  ;;  %p4621_p5 = scmp.lt.u32.totalorder %s4833_s24, %s5512_s0 }
  0x17   : > { %p4618_p3 = pnand %p4617_p2, %p4616_p1  ;;  %p4622_p7 = scmp.lt.u32.totalorder %s4620_s21, %s4615_s13 }
  0x18   : > { %p4624_p10 = scmp.lt.u32.totalorder %s4615_s13, %s4833_s24 }
  0x19   : > { %p4619_p4 = pneg %p4618_p3  ;;  %p4623_p8 = por %p4622_p7, %p4621_p5 }
  0x1b   : > { %p4625_p9 = por %p4624_p10, %p4623_p8 }
  0x1d   : > { %p4626_p0 = pnand %p4625_p9, %p4619_p4 }
  0x1f   : > { %4629 = shalt.err (!%p4626_p0)
}
  0x20   : > { %s4630_s19 = scalar_lea.vmem %s4841_s26, 2048  ;;  %s4713_s25 = smov [#allocation2]  }
  0x21   : > { %p4631_p1 = scmp.ne.s32.totalorder %s4841_s26, %s4630_s19  ;;  %s4635_s15 = sshll.u32 %s4713_s25, 4  ;;  %s4636_s15 = int_to_ptr.vmem [resolvable:$false] %s4635_s15 }
  0x22   : > { %s4637_s20 = scalar_lea.vmem %s4636_s15, 4096  ;;  %p4638_p11 = scmp.lt.s32.totalorder %s4841_s26, %s4636_s15 }
  0x23   : > { %p4633_p3 = pnand %p4631_p1, %p4617_p2  ;;  %p4639_p5 = scmp.lt.s32.totalorder %s4637_s20, %s4630_s19 }
  0x25   : > { %p4634_p12 = pneg %p4633_p3  ;;  %p4640_p7 = por %p4639_p5, %p4638_p11 }
  0x27   : > { %p4641_p8 = pnand %p4640_p7, %p4634_p12 }
  0x29   : > { %4644 = shalt.err (!%p4641_p8)
}
  0x2a   : > { %s4714_s13 = smov 256   ;;  %s4715_s21 = smov 128  }
  0x2b   : > { %s4716_s22 = smov 8   ;;  %p280_p9 = scmp.lt.s32.totalorder %s4711_s30, 3 }
  0x2c   : > { %4423 = dma.hbm_to_vmem [thread:$0]  (!%p4837_p13), %s4833_s24, 2048, %s4841_s26, %s4844_s12, %s4714_s13, %s4715_s21, %s4716_s22  }
  0x2d   : > { %p5527_p0 = scmp.ge.s32.totalorder %s4711_s30, 1 }
  0x2f   : > { %p281_p2 = pnand %p5527_p0, %p280_p9 }
  0x30   : > { %s4876_s23 = sand.u32 (!%p281_p2), 1, %s4703_s28  }
  0x31   : > { %284 = sbr.rel (%p281_p2) target bundleno = 2559 (0x9ff), region = 52  ;;  %s3422_s19 = sshll.u32 (!%p281_p2), %s4876_s23, 7 }
  0x32   : > { %s287_s25 = scalar_lea.sflag (!%p281_p2), [#allocation3], %s4876_s23  ;;  %s4880_s15 = scalar_lea.vmem (!%p281_p2), [#allocation2], %s3422_s19 }
  0x38   : > { %4690 = dma.done.wait (%p4813_p6), %s287_s25, 2048  }
  0x39   : > { %4692 = vsyncadd (%p4813_p6), %s287_s25, 4294965248  ;;  %v4717_v0 = vmov 0   ;;  %v323_v1 = vld [vmem:[%s4880_s15] sm:$0xff]  ;;  %v324_v2 = vld [vmem:[%s4880_s15 + $0x8] sm:$0xff]  ;;  %vm497_vm0 = vcmask 130048   ;;  %vm595_vm5 = vcmask 261120  }
  0x3a   : > { %4472 = vset.pattern.permute.xlu0 %v4717_v0  ;;  %4473 = vset.pattern.permute.xlu1 %v4717_v0  ;;  %v325_v3 = vld [vmem:[%s4880_s15 + $0x10] sm:$0xff]  ;;  %v326_v4 = vld [vmem:[%s4880_s15 + $0x18] sm:$0xff]  ;;  %v327_v5 = vld [vmem:[%s4880_s15 + $0x20] sm:$0xff]  ;;  %vm4720_vm6 = vmmov 0   ;;  %s3423_s16 = sshll.u32 %s4876_s23, 6  ;;  %s3550_s26 = sshll.u32 %s4791_s9, 7 }
  0x3b   : > { %v328_v6 = vld [vmem:[%s4880_s15 + $0x28] sm:$0xff]  ;;  %v339_v7 = vadd.f32 %v325_v3, %v323_v1  ;;  %v329_v8 = vld [vmem:[%s4880_s15 + $0x30] sm:$0xff]  ;;  %v346_v9 = vadd.f32 %v326_v4, %v324_v2  ;;  %v330_v10 = vld [vmem:[%s4880_s15 + $0x38] sm:$0xff]  ;;  %s5209_s24 = scalar_lea.vmem [#allocation5], %s3423_s16  ;;  %s5466_s12 = scalar_lea.hbm %s5520_s8, %s3550_s26 }
  0x3c   : > { %v331_v12 = vld [vmem:[%s4880_s15 + $0x40] sm:$0xff]  ;;  %v332_v14 = vld [vmem:[%s4880_s15 + $0x48] sm:$0xff]  ;;  %v333_v17 = vld [vmem:[%s4880_s15 + $0x50] sm:$0xff]  ;;  %s3343_s16 = sshll.u32 %s5209_s24, 4  ;;  %s3331_s20 = scalar_lea.sflag [#allocation4], %s4876_s23  ;;  %s5461_s16 = int_to_ptr.vmem [resolvable:$true] %s3343_s16 }
  0x3d   : > { %v340_v11 = vadd.f32 %v339_v7, %v327_v5  ;;  %v347_v13 = vadd.f32 %v346_v9, %v328_v6  ;;  %v4899_v16 = vld [vmem:[%s5513_s1] sm:$0xff]  ;;  %v334_v19 = vld [vmem:[%s4880_s15 + $0x58] sm:$0xff]  ;;  %v439_v24 = vld [vmem:[%s5515_s3 + $0x10] sm:$0xff]  ;;  %s4645_s13 = scalar_lea.vmem %s5461_s16, 1024  ;;  %p5528_p11 = scmp.ne.s32.totalorder %s5524_s17, 0 }
  0x3e   : > { %3770 = vmatprep.mubr.msk.f32.mxu0 %vm497_vm0, %v4899_v16  ;;  %v335_v21 = vld [vmem:[%s4880_s15 + $0x60] sm:$0xff]  ;;  %v336_v25 = vld [vmem:[%s4880_s15 + $0x68] sm:$0xff]  ;;  %453 = vperm.xlu1 %4473, %v439_v24   ;;  %v337_v27 = vld [vmem:[%s4880_s15 + $0x70] sm:$0xff]  ;;  %p4646_p6 = scmp.ne.s32.totalorder %s5461_s16, %s4645_s13  ;;  %s4721_s9 = smov [#allocation5]  }
  0x3f   : > { %v341_v15 = vadd.f32 %v340_v11, %v329_v8  ;;  %v348_v18 = vadd.f32 %v347_v13, %v330_v10  ;;  %v437_v23 = vld [vmem:[%s5515_s3] sm:$0xff]  ;;  %v438_v29 = vld [vmem:[%s5515_s3 + $0x8] sm:$0xff]  ;;  %v440_v30 = vld [vmem:[%s5515_s3 + $0x18] sm:$0xff]  ;;  %s4649_s21 = sshll.u32 %s4721_s9, 4  ;;  %s4650_s21 = int_to_ptr.vmem [resolvable:$false] %s4649_s21 }
  0x40   : > { %443 = vperm.xlu0 %4472, %v437_v23   ;;  %v338_v31 = vld [vmem:[%s4880_s15 + $0x78] sm:$0xff]  ;;  %v461_v36 = vld [vmem:[%s5517_s5] sm:$0xff]  ;;  %v462_v38 = vld [vmem:[%s5517_s5 + $0x8] sm:$0xff]  ;;  %p4647_p12 = pnand %p4646_p6, %p5528_p11  ;;  %s4651_s22 = scalar_lea.vmem %s4650_s21, 2048 }
  0x41   : > { %v342_v20 = vadd.f32 %v341_v15, %v331_v12  ;;  %v349_v22 = vadd.f32 %v348_v18, %v332_v14  ;;  %v463_v44 = vld [vmem:[%s5517_s5 + $0x10] sm:$0xff]  ;;  %v464_v47 = vld [vmem:[%s5517_s5 + $0x18] sm:$0xff]  ;;  %v485_v54 = vld [vmem:[%s5519_s7] sm:$0xff]  ;;  %p4652_p4 = scmp.lt.s32.totalorder %s5461_s16, %s4650_s21  ;;  %p4653_p10 = scmp.lt.s32.totalorder %s4651_s22, %s4645_s13 }
  0x42   : > { %458 = vperm.xlu1 %4473, %v440_v30   ;;  %p4648_p13 = pneg %p4647_p12 }
  0x43   : > { %v343_v26 = vadd.f32 %v342_v20, %v333_v17  ;;  %v350_v28 = vadd.f32 %v349_v22, %v334_v19  ;;  %p4654_p1 = por %p4653_p10, %p4652_p4 }
  0x44   : > { %448 = vperm.xlu0 %4472, %v438_v29  }
  0x45   : > { %v344_v32 = vadd.f32 %v343_v26, %v335_v21  ;;  %v351_v33 = vadd.f32 %v350_v28, %v336_v25  ;;  %p4655_p3 = pnand %p4654_p1, %p4648_p13 }
  0x46   : > { %472 = vperm.xlu1 %4473, %v462_v38  }
  0x47   : > { %v345_v34 = vadd.f32 %v344_v32, %v337_v27  ;;  %v352_v35 = vadd.f32 %v351_v33, %v338_v31 }
  0x48   : > { %467 = vperm.xlu0 %4472, %v461_v36  }
  0x49   : > { %v4924_v37 = vmul.f32 0.125, %v345_v34  ;;  %v4929_v39 = vmul.f32 0.125, %v352_v35 }
  0x4a   : > { %482 = vperm.xlu1 %4473, %v464_v47  }
  0x4b   : > { %v4932_v40 = vsub.f32 %v323_v1, %v4924_v37  ;;  %v4935_v41 = vsub.f32 %v325_v3, %v4924_v37  ;;  %v4938_v42 = vsub.f32 %v324_v2, %v4929_v39  ;;  %v4941_v43 = vsub.f32 %v326_v4, %v4929_v39 }
  0x4c   : > { %v4947_v45 = vsub.f32 %v327_v5, %v4924_v37  ;;  %v4950_v46 = vsub.f32 %v328_v6, %v4929_v39  ;;  %v4956_v48 = vsub.f32 %v329_v8, %v4924_v37  ;;  %v4959_v49 = vsub.f32 %v330_v10, %v4929_v39  ;;  %477 = vperm.xlu0 %4472, %v463_v44  }
  0x4d   : > { %v372_v50 = vmul.f32 %v4932_v40, %v4932_v40  ;;  %v373_v51 = vmul.f32 %v4938_v42, %v4938_v42  ;;  %v374_v52 = vmul.f32 %v4935_v41, %v4935_v41  ;;  %v375_v53 = vmul.f32 %v4941_v43, %v4941_v43 }
  0x4e   : > { %v4973_v55 = vsub.f32 %v331_v12, %v4924_v37  ;;  %v4976_v56 = vsub.f32 %v332_v14, %v4929_v39  ;;  %v376_v57 = vmul.f32 %v4947_v45, %v4947_v45  ;;  %v377_v58 = vmul.f32 %v4950_v46, %v4950_v46 }
  0x4f   : > { %v4983_v59 = vsub.f32 %v333_v17, %v4924_v37  ;;  %v4986_v60 = vsub.f32 %v334_v19, %v4929_v39  ;;  %v378_v61 = vmul.f32 %v4956_v48, %v4956_v48  ;;  %v379_v62 = vmul.f32 %v4959_v49, %v4959_v49 }
  0x50   : > { %v388_v63 = vadd.f32 %v374_v52, %v372_v50  ;;  %v395_v0 = vadd.f32 %v375_v53, %v373_v51  ;;  %488 = vperm.xlu0 %4472, %v485_v54   ;;  %v4993_v1 = vsub.f32 %v335_v21, %v4924_v37  ;;  %v4996_v2 = vsub.f32 %v336_v25, %v4929_v39 }
  0x51   : > { %v380_v3 = vmul.f32 %v4973_v55, %v4973_v55  ;;  %v381_v4 = vmul.f32 %v4976_v56, %v4976_v56  ;;  %v370_v7 = vsub.f32 %v337_v27, %v4924_v37  ;;  %v371_v8 = vsub.f32 %v338_v31, %v4929_v39 }
  0x52   : > { %v389_v5 = vadd.f32 %v388_v63, %v376_v57  ;;  %v396_v6 = vadd.f32 %v395_v0, %v377_v58  ;;  %v382_v9 = vmul.f32 %v4983_v59, %v4983_v59  ;;  %v383_v10 = vmul.f32 %v4986_v60, %v4986_v60  ;;  %v5023_v57 = vld [vmem:[%s5513_s1 + $0x8] sm:$0xff]  ;;  %v5058_v63 = vld [vmem:[%s5514_s2 + $0x10] sm:$0xff]  ;;  %v5067_v0 = vld [vmem:[%s5514_s2 + $0x18] sm:$0xff] }
  0x53   : > { %v384_v13 = vmul.f32 %v4993_v1, %v4993_v1  ;;  %v385_v14 = vmul.f32 %v4996_v2, %v4996_v2  ;;  %v386_v18 = vmul.f32 %v370_v7, %v370_v7  ;;  %v387_v19 = vmul.f32 %v371_v8, %v371_v8 }
  0x54   : > { %v390_v11 = vadd.f32 %v389_v5, %v378_v61  ;;  %v397_v12 = vadd.f32 %v396_v6, %v379_v62  ;;  %v4718_v58 = vmov 0.0   ;;  %v5029_v61 = vld [vmem:[%s5513_s1 + $0x10] sm:$0xff]  ;;  %v5053_v62 = vld [vmem:[%s5514_s2 + $0x8] sm:$0xff] }
  0x56   : > { %v391_v15 = vadd.f32 %v390_v11, %v380_v3  ;;  %v398_v17 = vadd.f32 %v397_v12, %v381_v4 }
  0x58   : > { %v392_v20 = vadd.f32 %v391_v15, %v382_v9  ;;  %v399_v21 = vadd.f32 %v398_v17, %v383_v10 }
  0x5a   : > { %v393_v22 = vadd.f32 %v392_v20, %v384_v13  ;;  %v400_v23 = vadd.f32 %v399_v21, %v385_v14 }
  0x5c   : > { %v394_v24 = vadd.f32 %v393_v22, %v386_v18  ;;  %v401_v25 = vadd.f32 %v400_v23, %v387_v19 }
  0x5e   : > { %v402_v26 = vmul.f32 0.14285715, %v394_v24  ;;  %v403_v27 = vmul.f32 0.14285715, %v401_v25  ;;  %v5107_v24 = vld [vmem:[%s5516_s4 + $0x8] sm:$0xff]  ;;  %v5112_v25 = vld [vmem:[%s5516_s4 + $0x10] sm:$0xff] }
  0x60   : > { %4474 = vrsqrt.f32 %v402_v26  ;;  %vm406_vm1 = vcmp.eq.f32.partialorder %v402_v26, inf  ;;  %v409_v29 = vand.u32 2147483648, %v402_v26  ;;  %vm408_vm2 = vcmp.eq.f32.partialorder %v402_v26, 0.0 }
  0x61   : > { %4476 = vrsqrt.f32 %v403_v27  ;;  %vm413_vm3 = vcmp.eq.f32.partialorder %v403_v27, inf  ;;  %v416_v32 = vand.u32 2147483648, %v403_v27  ;;  %vm415_vm4 = vcmp.eq.f32.partialorder %v403_v27, 0.0 }
  0x6a   : > { %v4475_v28 = vpop.eup %4474 }
  0x6b   : > { %v4477_v30 = vpop.eup %4476  ;;  %v405_v31 = vmul.f32 %v4475_v28, %v402_v26 }
  0x6c   : > { %v412_v33 = vmul.f32 %v4477_v30, %v403_v27  ;;  %v4719_v30 = vmov 0.0|0.0  }
  0x6d   : > { %v407_v34 = vsel %vm406_vm1, %v402_v26, %v405_v31  ;;  %v5125_v26 = vld [vmem:[%s5516_s4 + $0x18] sm:$0xff] }
  0x6e   : > { %v410_v35 = vsel %vm408_vm2, %v409_v29, %v407_v34  ;;  %v414_v36 = vsel %vm413_vm3, %v403_v27, %v412_v33 }
  0x6f   : > { %v417_v38 = vsel %vm415_vm4, %v416_v32, %v414_v36  ;;  %v418_v44 = vadd.f32 1e-08, %v410_v35 }
  0x70   : > { %v419_v47 = vadd.f32 1e-08, %v417_v38 }
  0x71   : > { %4478 = vrcp.f32 %v418_v44 }
  0x72   : > { %4480 = vrcp.f32 %v419_v47 }
  0x7b   : > { %v5012_v50 = vpop.eup %4478 }
  0x7c   : > { %v5014_v51 = vpop.eup %4480  ;;  %v495_v52 = vmul.f32 %v5012_v50, %v4932_v40  ;;  %v5039_v40 = vld [vmem:[%s5513_s1 + $0x18] sm:$0xff]  ;;  %v885_v3 = vmul.f32 %v5012_v50, %v4935_v41  ;;  %v5088_v41 = vld [vmem:[%s5516_s4] sm:$0xff]  ;;  %v1235_v27 = vmul.f32 %v5012_v50, %v4947_v45 }
  0x7d   : > { %v496_v53 = vmul.f32 %v5014_v51, %v4938_v42  ;;  %v5044_v42 = vld [vmem:[%s5514_s2] sm:$0xff]  ;;  %v886_v4 = vmul.f32 %v5014_v51, %v4941_v43  ;;  %3792 = vmatprep.mubr.msk.f32.mxu1 %vm595_vm5, %v5088_v41  ;;  %v1236_v28 = vmul.f32 %v5014_v51, %v4950_v46 }
  0x7f   : > { %v4152_v54 = vpack.c.bf16 %v496_v53, %v495_v52  ;;  %v4170_v5 = vpack.c.bf16 %v886_v4, %v885_v3  ;;  %v4196_v29 = vpack.c.bf16 %v1236_v28, %v1235_v27 }
  0x81   : > { %4153 = vmatprep.subr.bf16.mxu0 %v4152_v54 }
  0x82   : > { %4155 = vmatpush3.bf16.msra.mxu0 %v4152_v54 }
  0x83   : > { %3776 = vmatprep.subr.mxu0 %v4718_v58 }
  0x85   : > { %3771 = vmatmul.mubr.msk.f32.vlgmr.msra.gmra.mrb[0].mxu0 %vm497_vm0, %v5023_v57 }
  0x86   : > { %3777 = vmatpush3.msra.mxu0 %v4718_v58  ;;  %3773 = vmatprep.mubr.msk.f32.mxu0 %vm497_vm0, %v5029_v61 }
  0x87   : > { %4171 = vmatprep.subr.bf16.mxu0 %v4170_v5 }
  0x89   : > { %3774 = vmatmul.mubr.msk.f32.gmra.mrb[2].mxu0 %vm497_vm0, %v5039_v40 }
  0x8a   : > { %3778 = vmatprep.mubr.msk.f32.mxu0 %vm595_vm5, %v5044_v42 }
  0x8d   : > { %3779 = vmatmul.mubr.msk.f32.vlgmr.msra.gmra.mrb[0].mxu0 %vm595_vm5, %v5053_v62 }
  0x8e   : > { %3781 = vmatprep.mubr.msk.f32.mxu0 %vm595_vm5, %v5058_v63  ;;  %4173 = vmatpush3.bf16.msra.mxu0 %v4170_v5 }
  0x91   : > { %3782 = vmatmul.mubr.msk.f32.gmra.mrb[2].mxu0 %vm595_vm5, %v5067_v0 }
  0x92   : > { %3813 = vmatprep.mubr.msk.f32.mxu0 %vm497_vm0, %v4899_v16 }
  0x95   : > { %3814 = vmatmul.mubr.msk.f32.vlgmr.msra.gmra.mrb[4].mxu0 %vm497_vm0, %v5023_v57 }
  0x96   : > { %3816 = vmatprep.mubr.msk.f32.mxu0 %vm497_vm0, %v5029_v61 }
  0x99   : > { %3817 = vmatmul.mubr.msk.f32.gmra.mrb[6].mxu0 %vm497_vm0, %v5039_v40 }
  0x9a   : > { %3827 = vmatprep.mubr.msk.f32.mxu0 %vm595_vm5, %v5044_v42 }
  0xbd   : > { %v5094_v6 = vpop.permute.xlu1 %453 }
  0xbf   : > { %v5092_v43 = vpop.permute.xlu0 %443 }
  0xc1   : > { %v5100_v12 = vpop.permute.xlu1 %458 }
  0xc3   : > { %v5096_v7 = vpop.permute.xlu0 %448 }
  0xc5   : > { %v5150_v46 = vpop.permute.xlu1 %472 }
  0xc7   : > { %v5148_v45 = vpop.permute.xlu0 %467 }
  0xc9   : > { %v5158_v52 = vpop.permute.xlu1 %482 }
  0xcb   : > { %v5156_v47 = vpop.permute.xlu0 %477 }
 0x160   : > { %v3780_v8 = vpop.f32.mrb[0].mxu0 }
 0x161   : > { %v4352_v9 = vadd.f32 %v3780_v8, %v5096_v7  ;;  %v674_v10 = vpop.f32.mrb[1].mxu0 }
 0x162   : > { %v4353_v11 = vadd.f32 %v674_v10, %v5092_v43 }
 0x163   : > { %4482 = vtanh.f32 %v4352_v9 }
 0x164   : > { %4484 = vtanh.f32 %v4353_v11  ;;  %v3783_v13 = vpop.f32.mrb[2].mxu0 }
 0x165   : > { %v4354_v14 = vadd.f32 %v3783_v13, %v5100_v12  ;;  %v684_v15 = vpop.f32.mrb[3].mxu0 }
 0x166   : > { %v4355_v17 = vadd.f32 %v684_v15, %v5094_v6 }
 0x167   : > { %4486 = vtanh.f32 %v4354_v14 }
 0x168   : > { %4488 = vtanh.f32 %v4355_v17 }
 0x16d   : > { %v4483_v18 = vpop.eup %4482 }
 0x16e   : > { %v4485_v19 = vpop.eup %4484 }
 0x16f   : > { %v4156_v20 = vpack.c.bf16 %v4483_v18, %v4485_v19 }
 0x171   : > { %v4487_v21 = vpop.eup %4486  ;;  %4157 = vmatprep.subr.bf16.mxu1 %v4156_v20  ;;  %4175 = vmatprep.subr.bf16.mxu0 %v4156_v20 }
 0x172   : > { %v4489_v22 = vpop.eup %4488  ;;  %4159 = vmatpush3.bf16.msra.mxu1 %v4156_v20  ;;  %4177 = vmatpush3.bf16.msra.mxu0 %v4156_v20 }
 0x173   : > { %v4160_v23 = vpack.c.bf16 %v4487_v21, %v4489_v22 }
 0x175   : > { %4161 = vmatprep.subr.bf16.mxu1 %v4160_v23  ;;  %4179 = vmatprep.subr.bf16.mxu0 %v4160_v23 }
 0x176   : > { %4163 = vmatpush3.bf16.msra.mxu1 %v4160_v23  ;;  %4181 = vmatpush3.bf16.msra.mxu0 %v4160_v23 }
 0x177   : > { %4197 = vmatprep.subr.bf16.mxu0 %v4196_v29  ;;  %4164 = vmatprep.subr.bf16.mxu1 %v4719_v30 }
 0x179   : > { %3793 = vmatmul.mubr.msk.f32.vlgmr.msra.gmra.mrb[0].mxu1 %vm595_vm5, %v5107_v24  ;;  %3828 = vmatmul.mubr.msk.f32.vlgmr.msra.gmra.mrb[4].mxu0 %vm595_vm5, %v5053_v62 }
 0x17a   : > { %3795 = vmatprep.mubr.msk.f32.mxu1 %vm595_vm5, %v5112_v25  ;;  %3830 = vmatprep.mubr.msk.f32.mxu0 %vm595_vm5, %v5058_v63 }
 0x17b   : > { %4199 = vmatpush3.bf16.msra.mxu0 %v4196_v29 }
 0x17d   : > { %3796 = vmatmul.mubr.msk.f32.gmra.mrb[2].mxu1 %vm595_vm5, %v5125_v26  ;;  %3831 = vmatmul.mubr.msk.f32.gmra.mrb[6].mxu0 %vm595_vm5, %v5067_v0 }
 0x17e   : > { %3862 = vmatprep.mubr.msk.f32.mxu0 %vm497_vm0, %v4899_v16  ;;  %3806 = vmatprep.mubr.msk.f32.mxu1 %vm4720_vm6, %v4718_v58 }
 0x181   : > { %3863 = vmatmul.mubr.msk.f32.vlgmr.msra.gmra.mrb[8].mxu0 %vm497_vm0, %v5023_v57 }
 0x182   : > { %3865 = vmatprep.mubr.msk.f32.mxu0 %vm497_vm0, %v5029_v61 }
 0x185   : > { %3866 = vmatmul.mubr.msk.f32.gmra.mrb[10].mxu0 %vm497_vm0, %v5039_v40 }
 0x186   : > { %3876 = vmatprep.mubr.msk.f32.mxu0 %vm595_vm5, %v5044_v42 }
 0x24c   : > { %v3794_v31 = vpop.f32.mrb[0].mxu1  ;;  %v3829_v32 = vpop.f32.mrb[4].mxu0 }
 0x24d   : > { %v785_v33 = vadd.f32 %v3794_v31, %v5150_v46  ;;  %v4356_v34 = vadd.f32 %v3829_v32, %v5096_v7  ;;  %v779_v35 = vpop.f32.mrb[1].mxu1  ;;  %v1038_v36 = vpop.f32.mrb[5].mxu0 }
 0x24e   : > { %v780_v38 = vadd.f32 %v779_v35, %v5148_v45  ;;  %v4357_v44 = vadd.f32 %v1038_v36, %v5092_v43  ;;  %v1586_v35 = vmul.f32 %v5014_v51, %v4959_v49 }
 0x24f   : > { %v800_v53 = vmul.f32 1.442695, %v785_v33  ;;  %4490 = vtanh.f32 %v4356_v34  ;;  %v5168_v33 = vld [vmem:[%s5518_s6] sm:$0xff]  ;;  %v1585_v34 = vmul.f32 %v5012_v50, %v4956_v48  ;;  %v5204_v48 = vpop.permute.xlu0 %488 }
 0x250   : > { %v798_v54 = vmul.f32 1.442695, %v780_v38  ;;  %4492 = vtanh.f32 %v4357_v44  ;;  %v3797_v3 = vpop.f32.mrb[2].mxu1  ;;  %v3832_v4 = vpop.f32.mrb[6].mxu0 }
 0x251   : > { %4494 = vpow2.f32 %v800_v53  ;;  %v795_v5 = vadd.f32 %v3797_v3, %v5158_v52  ;;  %v4358_v8 = vadd.f32 %v3832_v4, %v5100_v12  ;;  %v789_v9 = vpop.f32.mrb[3].mxu1  ;;  %v1048_v10 = vpop.f32.mrb[7].mxu0  ;;  %v4222_v36 = vpack.c.bf16 %v1586_v35, %v1585_v34 }
 0x252   : > { %4496 = vpow2.f32 %v798_v54  ;;  %v790_v11 = vadd.f32 %v789_v9, %v5156_v47  ;;  %v4359_v13 = vadd.f32 %v1048_v10, %v5094_v6 }
 0x253   : > { %v804_v14 = vmul.f32 1.442695, %v795_v5  ;;  %4498 = vtanh.f32 %v4358_v8 }
 0x254   : > { %v802_v15 = vmul.f32 1.442695, %v790_v11  ;;  %4500 = vtanh.f32 %v4359_v13 }
 0x255   : > { %4502 = vpow2.f32 %v804_v14 }
 0x256   : > { %4504 = vpow2.f32 %v802_v15 }
 0x259   : > { %v4491_v17 = vpop.eup %4490 }
 0x25a   : > { %v4493_v18 = vpop.eup %4492 }
 0x25b   : > { %v4495_v19 = vpop.eup %4494  ;;  %v4182_v20 = vpack.c.bf16 %v4491_v17, %v4493_v18 }
 0x25c   : > { %v4497_v21 = vpop.eup %4496 }
 0x25d   : > { %v4499_v22 = vpop.eup %4498  ;;  %4201 = vmatprep.subr.bf16.mxu0 %v4182_v20  ;;  %v4165_v23 = vpack.c.bf16 %v4495_v19, %v4497_v21 }
 0x25e   : > { %v4501_v27 = vpop.eup %4500  ;;  %4203 = vmatpush3.bf16.msra.mxu0 %v4182_v20 }
 0x25f   : > { %v4503_v28 = vpop.eup %4502  ;;  %4166 = vmatpush3.bf16.msra.mxu1 %v4165_v23  ;;  %v4186_v29 = vpack.c.bf16 %v4499_v22, %v4501_v27 }
 0x260   : > { %v4505_v31 = vpop.eup %4504  ;;  %4167 = vmatprep.subr.bf16.mxu1 %v4719_v30 }
 0x261   : > { %4205 = vmatprep.subr.bf16.mxu0 %v4186_v29  ;;  %v4168_v32 = vpack.c.bf16 %v4503_v28, %v4505_v31 }
 0x262   : > { %4207 = vmatpush3.bf16.msra.mxu0 %v4186_v29 }
 0x263   : > { %4169 = vmatpush3.bf16.msra.mxu1 %v4168_v32  ;;  %4223 = vmatprep.subr.bf16.mxu0 %v4222_v36 }
 0x264   : > { %4183 = vmatprep.subr.bf16.mxu1 %v4182_v20 }
 0x265   : > { %3877 = vmatmul.mubr.msk.f32.vlgmr.msra.gmra.mrb[8].mxu0 %vm595_vm5, %v5053_v62 }
 0x266   : > { %3807 = vmatmul.mubr.msk.f32.vlgmr.msra.gmra.mrb[4].mxu1 %vm595_vm5, %v5168_v33  ;;  %3879 = vmatprep.mubr.msk.f32.mxu0 %vm595_vm5, %v5058_v63 }
 0x267   : > { %4185 = vmatpush3.bf16.msra.mxu1 %v4182_v20  ;;  %3841 = vmatprep.mubr.msk.f32.mxu1 %vm595_vm5, %v5088_v41 }
 0x268   : > { %4187 = vmatprep.subr.bf16.mxu1 %v4186_v29  ;;  %4225 = vmatpush3.bf16.msra.mxu0 %v4222_v36 }
 0x269   : > { %3880 = vmatmul.mubr.msk.f32.gmra.mrb[10].mxu0 %vm595_vm5, %v5067_v0 }
 0x26a   : > { %3911 = vmatprep.mubr.msk.f32.mxu0 %vm497_vm0, %v4899_v16 }
 0x26b   : > { %4189 = vmatpush3.bf16.msra.mxu1 %v4186_v29 }
 0x26c   : > { %4190 = vmatprep.subr.bf16.mxu1 %v4719_v30 }
 0x26d   : > { %3912 = vmatmul.mubr.msk.f32.vlgmr.msra.gmra.mrb[12].mxu0 %vm497_vm0, %v5023_v57 }
 0x26e   : > { %3842 = vmatmul.mubr.msk.f32.vlgmr.msra.gmra.mrb[6].mxu1 %vm595_vm5, %v5107_v24  ;;  %3914 = vmatprep.mubr.msk.f32.mxu0 %vm497_vm0, %v5029_v61 }
 0x26f   : > { %3844 = vmatprep.mubr.msk.f32.mxu1 %vm595_vm5, %v5112_v25 }
 0x271   : > { %3915 = vmatmul.mubr.msk.f32.gmra.mrb[14].mxu0 %vm497_vm0, %v5039_v40 }
 0x272   : > { %3845 = vmatmul.mubr.msk.f32.gmra.mrb[8].mxu1 %vm595_vm5, %v5125_v26  ;;  %3925 = vmatprep.mubr.msk.f32.mxu0 %vm595_vm5, %v5044_v42 }
 0x273   : > { %3855 = vmatprep.mubr.msk.f32.mxu1 %vm4720_vm6, %v4718_v58 }
 0x338   : > { %v3878_v38 = vpop.f32.mrb[8].mxu0 }
 0x339   : > { %v4360_v49 = vadd.f32 %v3878_v38, %v5096_v7  ;;  %v875_v44 = vpop.f32.mrb[4].mxu1  ;;  %v1388_v53 = vpop.f32.mrb[9].mxu0 }
 0x33a   : > { %v876_v54 = vadd.f32 %v875_v44, %v5204_v48  ;;  %v4361_v3 = vadd.f32 %v1388_v53, %v5092_v43  ;;  %v3808_v4 = vpop.f32.mrb[5].mxu1 }
 0x33b   : > { %4506 = vtanh.f32 %v4360_v49  ;;  %v1936_v4 = vmul.f32 %v5014_v51, %v4976_v56 }
 0x33c   : > { %879 = vst [vmem:[%s5209_s24] sm:$0xff] %v876_v54  ;;  %4508 = vtanh.f32 %v4361_v3  ;;  %v3881_v5 = vpop.f32.mrb[10].mxu0  ;;  %v1935_v3 = vmul.f32 %v5012_v50, %v4973_v55 }
 0x33d   : > { %v4362_v8 = vadd.f32 %v3881_v5, %v5100_v12  ;;  %v1398_v9 = vpop.f32.mrb[11].mxu0 }
 0x33e   : > { %v4363_v10 = vadd.f32 %v1398_v9, %v5094_v6  ;;  %v4248_v5 = vpack.c.bf16 %v1936_v4, %v1935_v3 }
 0x33f   : > { %4510 = vtanh.f32 %v4362_v8 }
 0x340   : > { %4512 = vtanh.f32 %v4363_v10 }
 0x341   : > { %v3843_v11 = vpop.f32.mrb[6].mxu1 }
 0x342   : > { %v1137_v13 = vadd.f32 %v3843_v11, %v5150_v46  ;;  %v1131_v14 = vpop.f32.mrb[7].mxu1 }
 0x343   : > { %v1132_v15 = vadd.f32 %v1131_v14, %v5148_v45 }
 0x344   : > { %v1152_v17 = vmul.f32 1.442695, %v1137_v13 }
 0x345   : > { %v4507_v18 = vpop.eup %4506  ;;  %v1150_v19 = vmul.f32 1.442695, %v1132_v15  ;;  %v3846_v20 = vpop.f32.mrb[8].mxu1 }
 0x346   : > { %v4509_v21 = vpop.eup %4508  ;;  %4514 = vpow2.f32 %v1152_v17  ;;  %v1147_v22 = vadd.f32 %v3846_v20, %v5158_v52  ;;  %v1141_v23 = vpop.f32.mrb[9].mxu1 }
 0x347   : > { %4516 = vpow2.f32 %v1150_v19  ;;  %v1142_v27 = vadd.f32 %v1141_v23, %v5156_v47  ;;  %v4208_v28 = vpack.c.bf16 %v4507_v18, %v4509_v21 }
 0x348   : > { %v1156_v29 = vmul.f32 1.442695, %v1147_v22 }
 0x349   : > { %v4511_v31 = vpop.eup %4510  ;;  %v1154_v32 = vmul.f32 1.442695, %v1142_v27  ;;  %4227 = vmatprep.subr.bf16.mxu0 %v4208_v28 }
 0x34a   : > { %v4513_v34 = vpop.eup %4512  ;;  %4518 = vpow2.f32 %v1156_v29  ;;  %4229 = vmatpush3.bf16.msra.mxu0 %v4208_v28 }
 0x34b   : > { %4520 = vpow2.f32 %v1154_v32  ;;  %v4212_v35 = vpack.c.bf16 %v4511_v31, %v4513_v34 }
 0x34d   : > { %4231 = vmatprep.subr.bf16.mxu0 %v4212_v35 }
 0x34e   : > { %4233 = vmatpush3.bf16.msra.mxu0 %v4212_v35 }
 0x34f   : > { %4249 = vmatprep.subr.bf16.mxu0 %v4248_v5 }
 0x350   : > { %v4515_v36 = vpop.eup %4514 }
 0x351   : > { %v4517_v38 = vpop.eup %4516  ;;  %3926 = vmatmul.mubr.msk.f32.vlgmr.msra.gmra.mrb[12].mxu0 %vm595_vm5, %v5053_v62 }
 0x352   : > { %v4191_v49 = vpack.c.bf16 %v4515_v36, %v4517_v38  ;;  %3928 = vmatprep.mubr.msk.f32.mxu0 %vm595_vm5, %v5058_v63  ;;  %4251 = vmatpush3.bf16.msra.mxu0 %v4248_v5 }
 0x354   : > { %v4519_v44 = vpop.eup %4518  ;;  %4192 = vmatpush3.bf16.msra.mxu1 %v4191_v49 }
 0x355   : > { %v4521_v53 = vpop.eup %4520  ;;  %3929 = vmatmul.mubr.msk.f32.gmra.mrb[14].mxu0 %vm595_vm5, %v5067_v0  ;;  %4193 = vmatprep.subr.bf16.mxu1 %v4719_v30 }
 0x356   : > { %v4194_v54 = vpack.c.bf16 %v4519_v44, %v4521_v53  ;;  %3960 = vmatprep.mubr.msk.f32.mxu0 %vm497_vm0, %v4899_v16 }
 0x358   : > { %4195 = vmatpush3.bf16.msra.mxu1 %v4194_v54 }
 0x359   : > { %4209 = vmatprep.subr.bf16.mxu1 %v4208_v28  ;;  %3961 = vmatmul.mubr.msk.f32.vlgmr.msra.gmra.mrb[16].mxu0 %vm497_vm0, %v5023_v57 }
 0x35a   : > { %3963 = vmatprep.mubr.msk.f32.mxu0 %vm497_vm0, %v5029_v61 }
 0x35b   : > { %3856 = vmatmul.mubr.msk.f32.vlgmr.msra.gmra.mrb[10].mxu1 %vm595_vm5, %v5168_v33 }
 0x35c   : > { %4211 = vmatpush3.bf16.msra.mxu1 %v4208_v28  ;;  %3890 = vmatprep.mubr.msk.f32.mxu1 %vm595_vm5, %v5088_v41 }
 0x35d   : > { %4213 = vmatprep.subr.bf16.mxu1 %v4212_v35  ;;  %3964 = vmatmul.mubr.msk.f32.gmra.mrb[18].mxu0 %vm497_vm0, %v5039_v40 }
 0x35e   : > { %3974 = vmatprep.mubr.msk.f32.mxu0 %vm595_vm5, %v5044_v42 }
 0x360   : > { %4215 = vmatpush3.bf16.msra.mxu1 %v4212_v35 }
 0x361   : > { %4216 = vmatprep.subr.bf16.mxu1 %v4719_v30 }
 0x363   : > { %3891 = vmatmul.mubr.msk.f32.vlgmr.msra.gmra.mrb[12].mxu1 %vm595_vm5, %v5107_v24 }
 0x364   : > { %3893 = vmatprep.mubr.msk.f32.mxu1 %vm595_vm5, %v5112_v25 }
 0x367   : > { %3894 = vmatmul.mubr.msk.f32.gmra.mrb[14].mxu1 %vm595_vm5, %v5125_v26 }
 0x368   : > { %3904 = vmatprep.mubr.msk.f32.mxu1 %vm4720_vm6, %v4718_v58 }
 0x424   : > { %v3927_v8 = vpop.f32.mrb[12].mxu0 }
 0x425   : > { %v4364_v55 = vadd.f32 %v3927_v8, %v5096_v7  ;;  %v1738_v56 = vpop.f32.mrb[13].mxu0 }
 0x426   : > { %v4365_v9 = vadd.f32 %v1738_v56, %v5092_v43 }
 0x427   : > { %4522 = vtanh.f32 %v4364_v55 }
 0x428   : > { %4524 = vtanh.f32 %v4365_v9  ;;  %v3930_v10 = vpop.f32.mrb[14].mxu0  ;;  %v2285_v9 = vmul.f32 %v5012_v50, %v4983_v59 }
 0x429   : > { %v4366_v11 = vadd.f32 %v3930_v10, %v5100_v12  ;;  %v1748_v13 = vpop.f32.mrb[15].mxu0  ;;  %v2286_v10 = vmul.f32 %v5014_v51, %v4986_v60 }
 0x42a   : > { %v4367_v14 = vadd.f32 %v1748_v13, %v5094_v6 }
 0x42b   : > { %4526 = vtanh.f32 %v4366_v11  ;;  %v4274_v11 = vpack.c.bf16 %v2286_v10, %v2285_v9 }
 0x42c   : > { %4528 = vtanh.f32 %v4367_v14 }
 0x42e   : > { %v1224_v15 = vpop.f32.mrb[10].mxu1 }
 0x42f   : > { %v1225_v17 = vadd.f32 %v1224_v15, %v5204_v48  ;;  %v3857_v18 = vpop.f32.mrb[11].mxu1 }
 0x431   : > { %v4523_v19 = vpop.eup %4522  ;;  %3452 = vst [vmem:[%s5209_s24 + $0x8] sm:$0xff] %v1225_v17 }
 0x432   : > { %v4525_v20 = vpop.eup %4524 }
 0x433   : > { %v4234_v21 = vpack.c.bf16 %v4523_v19, %v4525_v20 }
 0x435   : > { %v4527_v22 = vpop.eup %4526  ;;  %4253 = vmatprep.subr.bf16.mxu0 %v4234_v21 }
 0x436   : > { %v4529_v23 = vpop.eup %4528  ;;  %v3892_v27 = vpop.f32.mrb[12].mxu1  ;;  %4255 = vmatpush3.bf16.msra.mxu0 %v4234_v21 }
 0x437   : > { %v1487_v28 = vadd.f32 %v3892_v27, %v5150_v46  ;;  %v1481_v29 = vpop.f32.mrb[13].mxu1  ;;  %v4238_v31 = vpack.c.bf16 %v4527_v22, %v4529_v23 }
 0x438   : > { %v1482_v32 = vadd.f32 %v1481_v29, %v5148_v45 }
 0x439   : > { %v1502_v34 = vmul.f32 1.442695, %v1487_v28  ;;  %4257 = vmatprep.subr.bf16.mxu0 %v4238_v31 }
 0x43a   : > { %v1500_v35 = vmul.f32 1.442695, %v1482_v32  ;;  %v3895_v36 = vpop.f32.mrb[14].mxu1  ;;  %4259 = vmatpush3.bf16.msra.mxu0 %v4238_v31 }
 0x43b   : > { %4530 = vpow2.f32 %v1502_v34  ;;  %v1497_v38 = vadd.f32 %v3895_v36, %v5158_v52  ;;  %v1491_v49 = vpop.f32.mrb[15].mxu1  ;;  %4275 = vmatprep.subr.bf16.mxu0 %v4274_v11 }
 0x43c   : > { %4532 = vpow2.f32 %v1500_v35  ;;  %v1492_v44 = vadd.f32 %v1491_v49, %v5156_v47 }
 0x43d   : > { %v1506_v53 = vmul.f32 1.442695, %v1497_v38  ;;  %3975 = vmatmul.mubr.msk.f32.vlgmr.msra.gmra.mrb[16].mxu0 %vm595_vm5, %v5053_v62 }
 0x43e   : > { %v1504_v54 = vmul.f32 1.442695, %v1492_v44  ;;  %3977 = vmatprep.mubr.msk.f32.mxu0 %vm595_vm5, %v5058_v63  ;;  %4277 = vmatpush3.bf16.msra.mxu0 %v4274_v11 }
 0x43f   : > { %4534 = vpow2.f32 %v1506_v53 }
 0x440   : > { %4536 = vpow2.f32 %v1504_v54 }
 0x441   : > { %3978 = vmatmul.mubr.msk.f32.gmra.mrb[18].mxu0 %vm595_vm5, %v5067_v0 }
 0x442   : > { %4009 = vmatprep.mubr.msk.f32.mxu0 %vm497_vm0, %v4899_v16 }
 0x445   : > { %v4531_v3 = vpop.eup %4530  ;;  %4010 = vmatmul.mubr.msk.f32.vlgmr.msra.gmra.mrb[20].mxu0 %vm497_vm0, %v5023_v57 }
 0x446   : > { %v4533_v4 = vpop.eup %4532  ;;  %4012 = vmatprep.mubr.msk.f32.mxu0 %vm497_vm0, %v5029_v61 }
 0x447   : > { %v4217_v5 = vpack.c.bf16 %v4531_v3, %v4533_v4 }
 0x449   : > { %v4535_v8 = vpop.eup %4534  ;;  %4218 = vmatpush3.bf16.msra.mxu1 %v4217_v5  ;;  %4013 = vmatmul.mubr.msk.f32.gmra.mrb[22].mxu0 %vm497_vm0, %v5039_v40 }
 0x44a   : > { %v4537_v55 = vpop.eup %4536  ;;  %4219 = vmatprep.subr.bf16.mxu1 %v4719_v30  ;;  %4023 = vmatprep.mubr.msk.f32.mxu0 %vm595_vm5, %v5044_v42 }
 0x44b   : > { %v4220_v56 = vpack.c.bf16 %v4535_v8, %v4537_v55 }
 0x44d   : > { %4221 = vmatpush3.bf16.msra.mxu1 %v4220_v56 }
 0x44e   : > { %4235 = vmatprep.subr.bf16.mxu1 %v4234_v21 }
 0x450   : > { %3905 = vmatmul.mubr.msk.f32.vlgmr.msra.gmra.mrb[16].mxu1 %vm595_vm5, %v5168_v33 }
 0x451   : > { %4237 = vmatpush3.bf16.msra.mxu1 %v4234_v21  ;;  %3939 = vmatprep.mubr.msk.f32.mxu1 %vm595_vm5, %v5088_v41 }
 0x452   : > { %4239 = vmatprep.subr.bf16.mxu1 %v4238_v31 }
 0x455   : > { %4241 = vmatpush3.bf16.msra.mxu1 %v4238_v31 }
 0x456   : > { %4242 = vmatprep.subr.bf16.mxu1 %v4719_v30 }
 0x458   : > { %3940 = vmatmul.mubr.msk.f32.vlgmr.msra.gmra.mrb[18].mxu1 %vm595_vm5, %v5107_v24 }
 0x459   : > { %3942 = vmatprep.mubr.msk.f32.mxu1 %vm595_vm5, %v5112_v25 }
 0x45c   : > { %3943 = vmatmul.mubr.msk.f32.gmra.mrb[20].mxu1 %vm595_vm5, %v5125_v26 }
 0x45d   : > { %3953 = vmatprep.mubr.msk.f32.mxu1 %vm4720_vm6, %v4718_v58 }
 0x510   : > { %v3976_v13 = vpop.f32.mrb[16].mxu0 }
 0x511   : > { %v4368_v59 = vadd.f32 %v3976_v13, %v5096_v7  ;;  %v2088_v14 = vpop.f32.mrb[17].mxu0  ;;  %v2635_v13 = vmul.f32 %v5012_v50, %v4993_v1 }
 0x512   : > { %v4369_v60 = vadd.f32 %v2088_v14, %v5092_v43 }
 0x513   : > { %4538 = vtanh.f32 %v4368_v59  ;;  %v2636_v59 = vmul.f32 %v5014_v51, %v4996_v2 }
 0x514   : > { %4540 = vtanh.f32 %v4369_v60  ;;  %v3979_v15 = vpop.f32.mrb[18].mxu0 }
 0x515   : > { %v4370_v17 = vadd.f32 %v3979_v15, %v5100_v12  ;;  %v2098_v18 = vpop.f32.mrb[19].mxu0  ;;  %v4300_v14 = vpack.c.bf16 %v2636_v59, %v2635_v13 }
 0x516   : > { %v4371_v19 = vadd.f32 %v2098_v18, %v5094_v6 }
 0x517   : > { %4542 = vtanh.f32 %v4370_v17 }
 0x518   : > { %4544 = vtanh.f32 %v4371_v19 }
 0x51d   : > { %v4539_v20 = vpop.eup %4538 }
 0x51e   : > { %v4541_v21 = vpop.eup %4540 }
 0x51f   : > { %v4260_v22 = vpack.c.bf16 %v4539_v20, %v4541_v21 }
 0x521   : > { %v4543_v23 = vpop.eup %4542  ;;  %4279 = vmatprep.subr.bf16.mxu0 %v4260_v22 }
 0x522   : > { %v4545_v27 = vpop.eup %4544  ;;  %4281 = vmatpush3.bf16.msra.mxu0 %v4260_v22 }
 0x523   : > { %v1574_v28 = vpop.f32.mrb[16].mxu1  ;;  %v4264_v29 = vpack.c.bf16 %v4543_v23, %v4545_v27 }
 0x524   : > { %v1575_v31 = vadd.f32 %v1574_v28, %v5204_v48  ;;  %v3906_v32 = vpop.f32.mrb[17].mxu1 }
 0x525   : > { %4283 = vmatprep.subr.bf16.mxu0 %v4264_v29 }
 0x526   : > { %3468 = vst [vmem:[%s5209_s24 + $0x10] sm:$0xff] %v1575_v31  ;;  %4285 = vmatpush3.bf16.msra.mxu0 %v4264_v29 }
 0x527   : > { %4301 = vmatprep.subr.bf16.mxu0 %v4300_v14 }
 0x529   : > { %4024 = vmatmul.mubr.msk.f32.vlgmr.msra.gmra.mrb[20].mxu0 %vm595_vm5, %v5053_v62 }
 0x52a   : > { %4026 = vmatprep.mubr.msk.f32.mxu0 %vm595_vm5, %v5058_v63  ;;  %4303 = vmatpush3.bf16.msra.mxu0 %v4300_v14  ;;  %v3533_v14 = vld [vmem:[%s4880_s15 + $0x70] sm:$0xff] }
 0x52b   : > { %v3941_v34 = vpop.f32.mrb[18].mxu1 }
 0x52c   : > { %v1837_v35 = vadd.f32 %v3941_v34, %v5150_v46  ;;  %v1831_v36 = vpop.f32.mrb[19].mxu1 }
 0x52d   : > { %v1832_v38 = vadd.f32 %v1831_v36, %v5148_v45  ;;  %4027 = vmatmul.mubr.msk.f32.gmra.mrb[22].mxu0 %vm595_vm5, %v5067_v0 }
 0x52e   : > { %v1852_v49 = vmul.f32 1.442695, %v1837_v35  ;;  %4058 = vmatprep.mubr.msk.f32.mxu0 %vm497_vm0, %v4899_v16  ;;  %v4610_v35 = vld [vmem:[%s5513_s1] sm:$0xff] }
 0x52f   : > { %v1850_v44 = vmul.f32 1.442695, %v1832_v38  ;;  %v3944_v53 = vpop.f32.mrb[20].mxu1 }
 0x530   : > { %4546 = vpow2.f32 %v1852_v49  ;;  %v1847_v54 = vadd.f32 %v3944_v53, %v5158_v52  ;;  %v1841_v3 = vpop.f32.mrb[21].mxu1 }
 0x531   : > { %4548 = vpow2.f32 %v1850_v44  ;;  %v1842_v4 = vadd.f32 %v1841_v3, %v5156_v47  ;;  %4059 = vmatmul.mubr.msk.f32.vlgmr.msra.gmra.mrb[24].mxu0 %vm497_vm0, %v5023_v57 }
 0x532   : > { %v1856_v5 = vmul.f32 1.442695, %v1847_v54  ;;  %4061 = vmatprep.mubr.msk.f32.mxu0 %vm497_vm0, %v5029_v61 }
 0x533   : > { %v1854_v8 = vmul.f32 1.442695, %v1842_v4 }
 0x534   : > { %4550 = vpow2.f32 %v1856_v5 }
 0x535   : > { %4552 = vpow2.f32 %v1854_v8  ;;  %4062 = vmatmul.mubr.msk.f32.gmra.mrb[26].mxu0 %vm497_vm0, %v5039_v40 }
 0x536   : > { %4072 = vmatprep.mubr.msk.f32.mxu0 %vm595_vm5, %v5044_v42 }
 0x53a   : > { %v4547_v55 = vpop.eup %4546 }
 0x53b   : > { %v4549_v56 = vpop.eup %4548 }
 0x53c   : > { %v4243_v9 = vpack.c.bf16 %v4547_v55, %v4549_v56 }
 0x53e   : > { %v4551_v10 = vpop.eup %4550  ;;  %4244 = vmatpush3.bf16.msra.mxu1 %v4243_v9 }
 0x53f   : > { %v4553_v11 = vpop.eup %4552  ;;  %4245 = vmatprep.subr.bf16.mxu1 %v4719_v30 }
 0x540   : > { %v4246_v16 = vpack.c.bf16 %v4551_v10, %v4553_v11 }
 0x542   : > { %4247 = vmatpush3.bf16.msra.mxu1 %v4246_v16 }
 0x543   : > { %4261 = vmatprep.subr.bf16.mxu1 %v4260_v22 }
 0x545   : > { %3954 = vmatmul.mubr.msk.f32.vlgmr.msra.gmra.mrb[22].mxu1 %vm595_vm5, %v5168_v33 }
 0x546   : > { %4263 = vmatpush3.bf16.msra.mxu1 %v4260_v22  ;;  %3988 = vmatprep.mubr.msk.f32.mxu1 %vm595_vm5, %v5088_v41 }
 0x547   : > { %4265 = vmatprep.subr.bf16.mxu1 %v4264_v29 }
 0x54a   : > { %4267 = vmatpush3.bf16.msra.mxu1 %v4264_v29 }
 0x54b   : > { %4268 = vmatprep.subr.bf16.mxu1 %v4719_v30 }
 0x54d   : > { %3989 = vmatmul.mubr.msk.f32.vlgmr.msra.gmra.mrb[24].mxu1 %vm595_vm5, %v5107_v24 }
 0x54e   : > { %3991 = vmatprep.mubr.msk.f32.mxu1 %vm595_vm5, %v5112_v25 }
 0x551   : > { %3992 = vmatmul.mubr.msk.f32.gmra.mrb[26].mxu1 %vm595_vm5, %v5125_v26 }
 0x552   : > { %4002 = vmatprep.mubr.msk.f32.mxu1 %vm4720_vm6, %v4718_v58 }
 0x5fc   : > { %v4025_v60 = vpop.f32.mrb[20].mxu0 }
 0x5fd   : > { %v4372_v1 = vadd.f32 %v4025_v60, %v5096_v7  ;;  %v2438_v15 = vpop.f32.mrb[21].mxu0  ;;  %v3534_v60 = vld [vmem:[%s4880_s15 + $0x78] sm:$0xff] }
 0x5fe   : > { %v4373_v2 = vadd.f32 %v2438_v15, %v5092_v43  ;;  %v2984_v15 = vsub.f32 %v3534_v60, %v4929_v39 }
 0x5ff   : > { %4554 = vtanh.f32 %v4372_v1  ;;  %v2983_v1 = vsub.f32 %v3533_v14, %v4924_v37 }
 0x600   : > { %4556 = vtanh.f32 %v4373_v2  ;;  %v4028_v17 = vpop.f32.mrb[22].mxu0 }
 0x601   : > { %v4374_v18 = vadd.f32 %v4028_v17, %v5100_v12  ;;  %v2448_v19 = vpop.f32.mrb[23].mxu0  ;;  %v2985_v2 = vmul.f32 %v5012_v50, %v2983_v1  ;;  %v2986_v17 = vmul.f32 %v5014_v51, %v2984_v15 }
 0x602   : > { %v4375_v20 = vadd.f32 %v2448_v19, %v5094_v6 }
 0x603   : > { %4558 = vtanh.f32 %v4374_v18  ;;  %v4326_v18 = vpack.c.bf16 %v2986_v17, %v2985_v2 }
 0x604   : > { %4560 = vtanh.f32 %v4375_v20 }
 0x609   : > { %v4555_v21 = vpop.eup %4554 }
 0x60a   : > { %v4557_v22 = vpop.eup %4556 }
 0x60b   : > { %v4286_v23 = vpack.c.bf16 %v4555_v21, %v4557_v22 }
 0x60d   : > { %v4559_v27 = vpop.eup %4558  ;;  %4305 = vmatprep.subr.bf16.mxu0 %v4286_v23 }
 0x60e   : > { %v4561_v28 = vpop.eup %4560  ;;  %4307 = vmatpush3.bf16.msra.mxu0 %v4286_v23 }
 0x60f   : > { %v4290_v29 = vpack.c.bf16 %v4559_v27, %v4561_v28 }
 0x611   : > { %4309 = vmatprep.subr.bf16.mxu0 %v4290_v29 }
 0x612   : > { %4311 = vmatpush3.bf16.msra.mxu0 %v4290_v29 }
 0x613   : > { %4327 = vmatprep.subr.bf16.mxu0 %v4326_v18 }
 0x615   : > { %4073 = vmatmul.mubr.msk.f32.vlgmr.msra.gmra.mrb[24].mxu0 %vm595_vm5, %v5053_v62 }
 0x616   : > { %4075 = vmatprep.mubr.msk.f32.mxu0 %vm595_vm5, %v5058_v63  ;;  %4329 = vmatpush3.bf16.msra.mxu0 %v4326_v18 }
 0x618   : > { %v1924_v31 = vpop.f32.mrb[22].mxu1 }
 0x619   : > { %v1925_v32 = vadd.f32 %v1924_v31, %v5204_v48  ;;  %v3955_v34 = vpop.f32.mrb[23].mxu1  ;;  %4076 = vmatmul.mubr.msk.f32.gmra.mrb[26].mxu0 %vm595_vm5, %v5067_v0 }
 0x61a   : > { %4107 = vmatprep.mubr.msk.f32.mxu0 %vm497_vm0, %v4610_v35 }
 0x61b   : > { %3484 = vst [vmem:[%s5209_s24 + $0x18] sm:$0xff] %v1925_v32 }
 0x61d   : > { %4108 = vmatmul.mubr.msk.f32.vlgmr.msra.gmra.mrb[28].mxu0 %vm497_vm0, %v5023_v57 }
 0x61e   : > { %4110 = vmatprep.mubr.msk.f32.mxu0 %vm497_vm0, %v5029_v61 }
 0x620   : > { %v3990_v36 = vpop.f32.mrb[24].mxu1 }
 0x621   : > { %v2187_v38 = vadd.f32 %v3990_v36, %v5150_v46  ;;  %v2181_v49 = vpop.f32.mrb[25].mxu1  ;;  %4111 = vmatmul.mubr.msk.f32.gmra.mrb[30].mxu0 %vm497_vm0, %v5039_v40 }
 0x622   : > { %v2182_v44 = vadd.f32 %v2181_v49, %v5148_v45  ;;  %4121 = vmatprep.mubr.msk.f32.mxu0 %vm595_vm5, %v5044_v42 }
 0x623   : > { %v2202_v53 = vmul.f32 1.442695, %v2187_v38 }
 0x624   : > { %v2200_v54 = vmul.f32 1.442695, %v2182_v44  ;;  %v3993_v3 = vpop.f32.mrb[26].mxu1 }
 0x625   : > { %4562 = vpow2.f32 %v2202_v53  ;;  %v2197_v4 = vadd.f32 %v3993_v3, %v5158_v52  ;;  %v2191_v5 = vpop.f32.mrb[27].mxu1 }
 0x626   : > { %4564 = vpow2.f32 %v2200_v54  ;;  %v2192_v8 = vadd.f32 %v2191_v5, %v5156_v47 }
 0x627   : > { %v2206_v55 = vmul.f32 1.442695, %v2197_v4 }
 0x628   : > { %v2204_v56 = vmul.f32 1.442695, %v2192_v8 }
 0x629   : > { %4566 = vpow2.f32 %v2206_v55 }
 0x62a   : > { %4568 = vpow2.f32 %v2204_v56 }
 0x62f   : > { %v4563_v9 = vpop.eup %4562 }
 0x630   : > { %v4565_v10 = vpop.eup %4564 }
 0x631   : > { %v4269_v11 = vpack.c.bf16 %v4563_v9, %v4565_v10 }
 0x633   : > { %v4567_v16 = vpop.eup %4566  ;;  %4270 = vmatpush3.bf16.msra.mxu1 %v4269_v11 }
 0x634   : > { %v4569_v13 = vpop.eup %4568  ;;  %4271 = vmatprep.subr.bf16.mxu1 %v4719_v30 }
 0x635   : > { %v4272_v59 = vpack.c.bf16 %v4567_v16, %v4569_v13 }
 0x637   : > { %4273 = vmatpush3.bf16.msra.mxu1 %v4272_v59 }
 0x638   : > { %4287 = vmatprep.subr.bf16.mxu1 %v4286_v23 }
 0x63a   : > { %4003 = vmatmul.mubr.msk.f32.vlgmr.msra.gmra.mrb[28].mxu1 %vm595_vm5, %v5168_v33 }
 0x63b   : > { %4289 = vmatpush3.bf16.msra.mxu1 %v4286_v23  ;;  %4037 = vmatprep.mubr.msk.f32.mxu1 %vm595_vm5, %v5088_v41 }
 0x63c   : > { %4291 = vmatprep.subr.bf16.mxu1 %v4290_v29 }
 0x63f   : > { %4293 = vmatpush3.bf16.msra.mxu1 %v4290_v29 }
 0x640   : > { %4294 = vmatprep.subr.bf16.mxu1 %v4719_v30 }
 0x642   : > { %4038 = vmatmul.mubr.msk.f32.vlgmr.msra.gmra.mrb[30].mxu1 %vm595_vm5, %v5107_v24 }
 0x643   : > { %4040 = vmatprep.mubr.msk.f32.mxu1 %vm595_vm5, %v5112_v25 }
 0x646   : > { %4041 = vmatmul.mubr.msk.f32.gmra.mrb[32].mxu1 %vm595_vm5, %v5125_v26 }
 0x647   : > { %4051 = vmatprep.mubr.msk.f32.mxu1 %vm4720_vm6, %v4718_v58 }
 0x6e8   : > { %v4074_v37 = vpop.f32.mrb[24].mxu0 }
 0x6e9   : > { %v4376_v39 = vadd.f32 %v4074_v37, %v5096_v7  ;;  %v2788_v50 = vpop.f32.mrb[25].mxu0 }
 0x6ea   : > { %v4377_v51 = vadd.f32 %v2788_v50, %v5092_v43 }
 0x6eb   : > { %4570 = vtanh.f32 %v4376_v39 }
 0x6ec   : > { %4572 = vtanh.f32 %v4377_v51  ;;  %v4077_v19 = vpop.f32.mrb[26].mxu0 }
 0x6ed   : > { %v4378_v57 = vadd.f32 %v4077_v19, %v5100_v12  ;;  %v2798_v20 = vpop.f32.mrb[27].mxu0 }
 0x6ee   : > { %v4379_v61 = vadd.f32 %v2798_v20, %v5094_v6 }
 0x6ef   : > { %4574 = vtanh.f32 %v4378_v57 }
 0x6f0   : > { %4576 = vtanh.f32 %v4379_v61 }
 0x6f5   : > { %v4571_v40 = vpop.eup %4570 }
 0x6f6   : > { %v4573_v21 = vpop.eup %4572 }
 0x6f7   : > { %v4312_v42 = vpack.c.bf16 %v4571_v40, %v4573_v21 }
 0x6f9   : > { %v4575_v22 = vpop.eup %4574  ;;  %4331 = vmatprep.subr.bf16.mxu0 %v4312_v42 }
 0x6fa   : > { %v4577_v23 = vpop.eup %4576  ;;  %4333 = vmatpush3.bf16.msra.mxu0 %v4312_v42 }
 0x6fb   : > { %v4316_v27 = vpack.c.bf16 %v4575_v22, %v4577_v23 }
 0x6fd   : > { %4335 = vmatprep.subr.bf16.mxu0 %v4316_v27 }
 0x6fe   : > { %4337 = vmatpush3.bf16.msra.mxu0 %v4316_v27 }
 0x701   : > { %4122 = vmatmul.mubr.msk.f32.vlgmr.msra.gmra.mrb[28].mxu0 %vm595_vm5, %v5053_v62 }
 0x702   : > { %4124 = vmatprep.mubr.msk.f32.mxu0 %vm595_vm5, %v5058_v63 }
 0x705   : > { %4125 = vmatmul.mubr.msk.f32.gmra.mrb[30].mxu0 %vm595_vm5, %v5067_v0 }
 0x70d   : > { %v2274_v28 = vpop.f32.mrb[28].mxu1 }
 0x70e   : > { %v2275_v29 = vadd.f32 %v2274_v28, %v5204_v48  ;;  %v4004_v31 = vpop.f32.mrb[29].mxu1  ;;  %v4611_v28 = vld [vmem:[%s5516_s4] sm:$0xff] }
 0x70f   : > { %v4613_v31 = vld [vmem:[%s5516_s4 + $0x10] sm:$0xff] }
 0x710   : > { %3500 = vst [vmem:[%s5209_s24 + $0x20] sm:$0xff] %v2275_v29  ;;  %v4612_v29 = vld [vmem:[%s5516_s4 + $0x8] sm:$0xff] }
 0x715   : > { %v4039_v32 = vpop.f32.mrb[30].mxu1 }
 0x716   : > { %v2537_v34 = vadd.f32 %v4039_v32, %v5150_v46  ;;  %v2531_v35 = vpop.f32.mrb[31].mxu1  ;;  %v4614_v32 = vld [vmem:[%s5516_s4 + $0x18] sm:$0xff] }
 0x717   : > { %v2532_v36 = vadd.f32 %v2531_v35, %v5148_v45 }
 0x718   : > { %v2552_v38 = vmul.f32 1.442695, %v2537_v34 }
 0x719   : > { %v2550_v49 = vmul.f32 1.442695, %v2532_v36  ;;  %v4042_v62 = vpop.f32.mrb[32].mxu1 }
 0x71a   : > { %4578 = vpow2.f32 %v2552_v38  ;;  %v2547_v63 = vadd.f32 %v4042_v62, %v5158_v52  ;;  %v2541_v44 = vpop.f32.mrb[33].mxu1 }
 0x71b   : > { %4580 = vpow2.f32 %v2550_v49  ;;  %v2542_v0 = vadd.f32 %v2541_v44, %v5156_v47 }
 0x71c   : > { %v2556_v53 = vmul.f32 1.442695, %v2547_v63 }
 0x71d   : > { %v2554_v54 = vmul.f32 1.442695, %v2542_v0 }
 0x71e   : > { %4582 = vpow2.f32 %v2556_v53 }
 0x71f   : > { %4584 = vpow2.f32 %v2554_v54 }
 0x724   : > { %v4579_v3 = vpop.eup %4578 }
 0x725   : > { %v4581_v4 = vpop.eup %4580 }
 0x726   : > { %v4295_v5 = vpack.c.bf16 %v4579_v3, %v4581_v4 }
 0x728   : > { %v4583_v8 = vpop.eup %4582  ;;  %4296 = vmatpush3.bf16.msra.mxu1 %v4295_v5 }
 0x729   : > { %v4585_v55 = vpop.eup %4584  ;;  %4297 = vmatprep.subr.bf16.mxu1 %v4719_v30 }
 0x72a   : > { %v4298_v56 = vpack.c.bf16 %v4583_v8, %v4585_v55 }
 0x72c   : > { %4299 = vmatpush3.bf16.msra.mxu1 %v4298_v56 }
 0x72d   : > { %4313 = vmatprep.subr.bf16.mxu1 %v4312_v42 }
 0x72f   : > { %4052 = vmatmul.mubr.msk.f32.vlgmr.msra.gmra.mrb[34].mxu1 %vm595_vm5, %v5168_v33 }
 0x730   : > { %4315 = vmatpush3.bf16.msra.mxu1 %v4312_v42  ;;  %4086 = vmatprep.mubr.msk.f32.mxu1 %vm595_vm5, %v5088_v41 }
 0x731   : > { %4317 = vmatprep.subr.bf16.mxu1 %v4316_v27 }
 0x734   : > { %4319 = vmatpush3.bf16.msra.mxu1 %v4316_v27 }
 0x735   : > { %4320 = vmatprep.subr.bf16.mxu1 %v4719_v30 }
 0x737   : > { %4087 = vmatmul.mubr.msk.f32.vlgmr.msra.gmra.mrb[36].mxu1 %vm595_vm5, %v5107_v24 }
 0x738   : > { %4089 = vmatprep.mubr.msk.f32.mxu1 %vm595_vm5, %v5112_v25 }
 0x73b   : > { %4090 = vmatmul.mubr.msk.f32.gmra.mrb[38].mxu1 %vm595_vm5, %v5125_v26 }
 0x73c   : > { %4100 = vmatprep.mubr.msk.f32.mxu1 %vm4720_vm6, %v4718_v58 }
 0x7d4   : > { %v4123_v9 = vpop.f32.mrb[28].mxu0 }
 0x7d5   : > { %v4380_v10 = vadd.f32 %v4123_v9, %v5096_v7  ;;  %v3138_v41 = vpop.f32.mrb[29].mxu0 }
 0x7d6   : > { %v4381_v11 = vadd.f32 %v3138_v41, %v5092_v43 }
 0x7d7   : > { %4586 = vtanh.f32 %v4380_v10 }
 0x7d8   : > { %4588 = vtanh.f32 %v4381_v11  ;;  %v4126_v16 = vpop.f32.mrb[30].mxu0 }
 0x7d9   : > { %v4382_v24 = vadd.f32 %v4126_v16, %v5100_v12  ;;  %v3148_v13 = vpop.f32.mrb[31].mxu0 }
 0x7da   : > { %v4383_v25 = vadd.f32 %v3148_v13, %v5094_v6 }
 0x7db   : > { %4590 = vtanh.f32 %v4382_v24 }
 0x7dc   : > { %4592 = vtanh.f32 %v4383_v25 }
 0x7e1   : > { %v4587_v26 = vpop.eup %4586 }
 0x7e2   : > { %v4589_v59 = vpop.eup %4588 }
 0x7e3   : > { %v4338_v14 = vpack.c.bf16 %v4587_v26, %v4589_v59 }
 0x7e5   : > { %v4591_v60 = vpop.eup %4590 }
 0x7e6   : > { %v4593_v1 = vpop.eup %4592 }
 0x7e7   : > { %v4342_v7 = vpack.c.bf16 %v4591_v60, %v4593_v1 }
 0x802   : > { %v2624_v15 = vpop.f32.mrb[34].mxu1 }
 0x803   : > { %v2625_v43 = vadd.f32 %v2624_v15, %v5204_v48  ;;  %v4053_v2 = vpop.f32.mrb[35].mxu1 }
 0x805   : > { %3516 = vst [vmem:[%s5209_s24 + $0x28] sm:$0xff] %v2625_v43 }
 0x80a   : > { %v4088_v17 = vpop.f32.mrb[36].mxu1 }
 0x80b   : > { %v2887_v18 = vadd.f32 %v4088_v17, %v5150_v46  ;;  %v2881_v12 = vpop.f32.mrb[37].mxu1 }
 0x80c   : > { %v2882_v37 = vadd.f32 %v2881_v12, %v5148_v45 }
 0x80d   : > { %v2902_v6 = vmul.f32 1.442695, %v2887_v18 }
 0x80e   : > { %v2900_v39 = vmul.f32 1.442695, %v2882_v37  ;;  %v4091_v50 = vpop.f32.mrb[38].mxu1 }
 0x80f   : > { %4594 = vpow2.f32 %v2902_v6  ;;  %v2897_v51 = vadd.f32 %v4091_v50, %v5158_v52  ;;  %v2891_v19 = vpop.f32.mrb[39].mxu1 }
 0x810   : > { %4596 = vpow2.f32 %v2900_v39  ;;  %v2892_v57 = vadd.f32 %v2891_v19, %v5156_v47 }
 0x811   : > { %v2906_v20 = vmul.f32 1.442695, %v2897_v51 }
 0x812   : > { %v2904_v61 = vmul.f32 1.442695, %v2892_v57 }
 0x813   : > { %4598 = vpow2.f32 %v2906_v20 }
 0x814   : > { %4600 = vpow2.f32 %v2904_v61 }
 0x819   : > { %v4595_v40 = vpop.eup %4594 }
 0x81a   : > { %v4597_v21 = vpop.eup %4596 }
 0x81b   : > { %v4321_v42 = vpack.c.bf16 %v4595_v40, %v4597_v21 }
 0x81d   : > { %v4599_v22 = vpop.eup %4598  ;;  %4322 = vmatpush3.bf16.msra.mxu1 %v4321_v42 }
 0x81e   : > { %v4601_v23 = vpop.eup %4600  ;;  %4323 = vmatprep.subr.bf16.mxu1 %v4719_v30 }
 0x81f   : > { %v4324_v27 = vpack.c.bf16 %v4599_v22, %v4601_v23 }
 0x821   : > { %4325 = vmatpush3.bf16.msra.mxu1 %v4324_v27 }
 0x822   : > { %4339 = vmatprep.subr.bf16.mxu1 %v4338_v14 }
 0x824   : > { %4101 = vmatmul.mubr.msk.f32.vlgmr.msra.gmra.mrb[40].mxu1 %vm595_vm5, %v5168_v33 }
 0x825   : > { %4341 = vmatpush3.bf16.msra.mxu1 %v4338_v14  ;;  %4135 = vmatprep.mubr.msk.f32.mxu1 %vm595_vm5, %v4611_v28 }
 0x826   : > { %4343 = vmatprep.subr.bf16.mxu1 %v4342_v7 }
 0x829   : > { %4345 = vmatpush3.bf16.msra.mxu1 %v4342_v7 }
 0x82a   : > { %4346 = vmatprep.subr.bf16.mxu1 %v4719_v30 }
 0x82c   : > { %4136 = vmatmul.mubr.msk.f32.vlgmr.msra.gmra.mrb[42].mxu1 %vm595_vm5, %v4612_v29 }
 0x82d   : > { %4138 = vmatprep.mubr.msk.f32.mxu1 %vm595_vm5, %v4613_v31 }
 0x830   : > { %4139 = vmatmul.mubr.msk.f32.gmra.mrb[44].mxu1 %vm595_vm5, %v4614_v32 }
 0x831   : > { %4149 = vmatprep.mubr.msk.f32.mxu1 %vm4720_vm6, %v4718_v58 }
 0x8f7   : > { %v2974_v34 = vpop.f32.mrb[40].mxu1 }
 0x8f8   : > { %v2975_v35 = vadd.f32 %v2974_v34, %v5204_v48  ;;  %v4102_v36 = vpop.f32.mrb[41].mxu1 }
 0x8fa   : > { %3532 = vst [vmem:[%s5209_s24 + $0x30] sm:$0xff] %v2975_v35 }
 0x8ff   : > { %v4137_v38 = vpop.f32.mrb[42].mxu1 }
 0x900   : > { %v3237_v49 = vadd.f32 %v4137_v38, %v5150_v46  ;;  %v3231_v62 = vpop.f32.mrb[43].mxu1 }
 0x901   : > { %v3232_v63 = vadd.f32 %v3231_v62, %v5148_v45 }
 0x902   : > { %v3252_v44 = vmul.f32 1.442695, %v3237_v49 }
 0x903   : > { %v3250_v0 = vmul.f32 1.442695, %v3232_v63  ;;  %v4140_v53 = vpop.f32.mrb[44].mxu1 }
 0x904   : > { %4602 = vpow2.f32 %v3252_v44  ;;  %v3247_v54 = vadd.f32 %v4140_v53, %v5158_v52  ;;  %v3241_v3 = vpop.f32.mrb[45].mxu1 }
 0x905   : > { %4604 = vpow2.f32 %v3250_v0  ;;  %v3242_v58 = vadd.f32 %v3241_v3, %v5156_v47 }
 0x906   : > { %v3256_v4 = vmul.f32 1.442695, %v3247_v54 }
 0x907   : > { %v3254_v5 = vmul.f32 1.442695, %v3242_v58 }
 0x908   : > { %4606 = vpow2.f32 %v3256_v4 }
 0x909   : > { %4608 = vpow2.f32 %v3254_v5 }
 0x90e   : > { %v4603_v46 = vpop.eup %4602 }
 0x90f   : > { %v4605_v8 = vpop.eup %4604 }
 0x910   : > { %v4347_v45 = vpack.c.bf16 %v4603_v46, %v4605_v8 }
 0x912   : > { %v4607_v55 = vpop.eup %4606  ;;  %4348 = vmatpush3.bf16.msra.mxu1 %v4347_v45 }
 0x913   : > { %v4609_v56 = vpop.eup %4608  ;;  %4349 = vmatprep.subr.bf16.mxu1 %v4719_v30 }
 0x914   : > { %v4350_v52 = vpack.c.bf16 %v4607_v55, %v4609_v56 }
 0x916   : > { %4351 = vmatpush3.bf16.msra.mxu1 %v4350_v52 }
 0x919   : > { %4150 = vmatmul.mubr.msk.f32.vlgmr.msra.gmra.mrb[46].mxu1 %vm595_vm5, %v5168_v33 }
 0x9ec   : > { %v3324_v47 = vpop.f32.mrb[46].mxu1 }
 0x9ed   : > { %v3325_v30 = vadd.f32 %v3324_v47, %v5204_v48  ;;  %v4151_v9 = vpop.f32.mrb[47].mxu1 }
 0x9ef   : > { %3548 = vst [vmem:[%s5209_s24 + $0x38] sm:$0xff] %v3325_v30 }
 0x9f0   : > { %4658 = shalt.err (!%p4655_p3)
}
 0x9f1   : > { %s4659_s24 = scalar_lea.hbm %s5466_s12, 1024  ;;  %s4663_s26 = scalar_lea.hbm %s5520_s8, 2048 }
 0x9f2   : > { %p4660_p5 = scmp.ne.s32.totalorder %s5466_s12, %s4659_s24  ;;  %p4664_p9 = scmp.lt.u32.totalorder %s5466_s12, %s5520_s8 }
 0x9f3   : > { %p4665_p0 = scmp.lt.u32.totalorder %s4663_s26, %s4659_s24  ;;  %p4667_p6 = scmp.lt.u32.totalorder %s4659_s24, %s5466_s12 }
 0x9f4   : > { %p4661_p7 = pnand %p4660_p5, %p5528_p11 }
 0x9f5   : > { %p4666_p2 = por %p4665_p0, %p4664_p9 }
 0x9f6   : > { %p4662_p8 = pneg %p4661_p7 }
 0x9f7   : > { %p4668_p12 = por %p4667_p6, %p4666_p2 }
 0x9f9   : > { %p4669_p13 = pnand %p4668_p12, %p4662_p8 }
 0x9fb   : > { %4672 = shalt.err (!%p4669_p13)
}
 0x9fc   : > { %s4722_s13 = smov 128   ;;  %s4723_s9 = smov 256  }
 0x9fd   : > { %s4724_s21 = smov 8  }
 0x9fe   : > { %4418 = dma.vmem_to_hbm [thread:$0]  (%p5528_p11), %s5461_s16, 1024, %s5466_s12, %s3331_s20, %s4722_s13, %s4723_s9, %s4724_s21  }
 0x9ff PF: > { %s3358_s22 = sand.u32 1, %s4699_s27   ;;  %p5529_p4 = scmp.ne.s32.totalorder %s5525_s18, 0 }
 0xa00   : > { %p5530_p10 = scmp.ge.s32.totalorder %s4711_s30, 2  ;;  %s3359_s24 = scalar_lea.sflag [#allocation4], %s3358_s22 }
 0xa02   : > { %p4425_p1 = pnand %p5530_p10, %p5529_p4 }
 0xa04   : > { %4694 = dma.done.wait (!%p4425_p1), %s3359_s24, 1024  }
 0xa05   : > { %4696 = vsyncadd (!%p4425_p1), %s3359_s24, 4294966272  ;;  %p21_p3 = scmp.ge.s32.totalorder %s4795_s11, 4   ;;  %s5531_s27 = smov %s4703_s28 }
 0xa06   : > { %s5532_s28 = smov %s4707_s29  ;;  %s5533_s29 = smov %s4807_s14 }
 0xa07   : > { %s5534_s30 = smov %s4795_s11  ;;  %23 = sbr.rel (!%p21_p3) target bundleno = 5 (0x5), region = 111 }
 0xa0e   :  { %3364 = vsyncpa [#allocation3], 1 }
 0xa0f   :  { %3366 = vsyncpa [#allocation3 + $0x1], 1 }
 0xa10   :  { %3367 = vsyncpa [#allocation4], 1 }
 0xa11   :  { %3369 = vsyncpa [#allocation4 + $0x1], 1 }

</bundles_post_ra>
